<compile_context>
chip_gen: v5e
topology: v5e:2x2
jax: 0.10.0
libtpu: 0.0.40
codegen_flags: <defaults>
</compile_context>

<pallas_src>
from functools import partial

import numpy as np
import jax
import jax.numpy as jnp
from jax import lax
from jax.experimental import pallas as pl
from jax.experimental.pallas import tpu as pltpu


def _num_tensorcores_per_chip():
    """1 TensorCore on v5e/v6e, 2 on v7x.  Best-effort; default to 1 (always safe)."""
    try:
        kind = jax.devices()[0].device_kind.lower()
    except Exception:
        return 1
    return 2 if ("v7" in kind or "7x" in kind) else 1


def _roll_lanes(x, d):
    """y[..., p] = x[..., (p + d) % n] via static slices + concat (unambiguous, well-supported)."""
    n = x.shape[-1]
    d %= n
    if d == 0:
        return x
    return jnp.concatenate([x[..., d:], x[..., :d]], axis=-1)


@partial(jax.jit, static_argnames=("interpolation_mode",))
def upsample_conv2d_forward(x, weight, bias, interpolation_mode="bilinear"):
    """Equivalent to Conv2d(padding=k//2, stride=1)(Upsample(scale=2, bilinear)(x)).

    x: (B, C_in, H, W) NCHW; weight: (C_out, C_in, KH, KW); bias: (C_out,).
    """
    assert interpolation_mode == "bilinear"
    B, C_in, H, W = x.shape
    C_out, C_in_w, KH, KW = weight.shape
    assert C_in_w == C_in
    assert KH % 2 == 1 and KW % 2 == 1, "fused kernel assumes odd kernel_size"
    pad_h, pad_w = KH // 2, KW // 2
    HW = H * W
    K = KH * KW * C_in                       # im2col contraction length
    K_pad = ((K + 1 + 7) // 8) * 8           # + bias row, rounded to sublane multiple
    out_dtype = x.dtype

    # ---- tiny wrapper-side prep (a handful of HLO ops on <= 8 KB tensors) ----
    x_flat = x.reshape(B, C_in, HW).astype(jnp.float32)
    w2 = jnp.transpose(weight, (0, 2, 3, 1)).reshape(C_out, K).astype(jnp.float32)
    w_full = jnp.concatenate(                     # bias folded into spare column K
        [w2, bias.reshape(C_out, 1).astype(jnp.float32),
         jnp.zeros((C_out, K_pad - K - 1), jnp.float32)], axis=1)
    # row/col index of every flattened H*W position (compile-time constant, 2 KB)
    rc = jnp.asarray(
        np.stack([np.repeat(np.arange(H), W), np.tile(np.arange(W), H)]),
        dtype=jnp.int32)

    # ---- generation-aware grid: 1 step on v5e/v6e, explicit 2-core split on v7x ----
    n_cores = _num_tensorcores_per_chip()
    if n_cores > 1 and B % n_cores == 0:
        n_steps = n_cores
        dim_sem = (getattr(pltpu, "CORE_PARALLEL", "parallel"),)
        resident_kwargs = dict(pipeline_mode=pl.Buffered(1))   # grid-invariant operands
    else:
        n_steps = 1
        dim_sem = ("arbitrary",)
        resident_kwargs = {}
    B_blk = B // n_steps
    NLb = B_blk * 4 * HW        # lanes per grid step: (batch, 2x2 output phase, H, W)
    NL = B * 4 * HW             # total lanes (lane-dense: multiple of 128 here)

    def kernel(x_ref, w_ref, rc_ref, o_ref, p_ref):
        row = rc_ref[0:1, :]          # (1, HW) int32 row index of each flattened pos
        col = rc_ref[1:2, :]          # (1, HW) int32 col index

        def shifted(img, sh, sw):
            # img value at (a+sh, w+sw), zero outside the HxW grid.
            y = _roll_lanes(img, sh * W + sw)
            if sh < 0:
                y = jnp.where(row < -sh, 0.0, y)
            elif sh > 0:
                y = jnp.where(row >= H - sh, 0.0, y)
            if sw < 0:
                y = jnp.where(col < -sw, 0.0, y)
            elif sw > 0:
                y = jnp.where(col >= W - sw, 0.0, y)
            return y

        # bias row (= 1.0) and zero pad rows of the patches matrix
        p_ref[K:K + 1, :] = jnp.ones((1, NLb), jnp.float32)
        if K_pad > K + 1:
            p_ref[K + 1:K_pad, :] = jnp.zeros((K_pad - K - 1, NLb), jnp.float32)

        for lb in range(B_blk):
            xb = x_ref[lb]                                # (C_in, HW) f32
            # --- bilinear 2x upsample phase images (align_corners=False), VPU lerps ---
            up_h = jnp.where(row == 0, xb, _roll_lanes(xb, -W))        # x[a-1, w]
            dn_h = jnp.where(row == H - 1, xb, _roll_lanes(xb, W))     # x[a+1, w]
            a_even = 0.25 * up_h + 0.75 * xb                           # U rows 2a
            a_odd = 0.75 * xb + 0.25 * dn_h                            # U rows 2a+1

            def up_w(y):
                lft = jnp.where(col == 0, y, _roll_lanes(y, -1))       # y[:, w-1]
                rgt = jnp.where(col == W - 1, y, _roll_lanes(y, 1))    # y[:, w+1]
                return 0.25 * lft + 0.75 * y, 0.75 * y + 0.25 * rgt

            ee, eo = up_w(a_even)
            oe, oo = up_w(a_odd)
            phase_img = {(0, 0): ee, (0, 1): eo, (1, 0): oe, (1, 1): oo}

            # --- im2col directly from phase images (no interleave, no HBM round trip) ---
            memo = {}
            for dp in range(2):
                for dq in range(2):
                    c0 = lb * 4 * HW + (2 * dp + dq) * HW
                    for kh in range(KH):
                        th = dp + kh - pad_h
                        rh, sh = th % 2, th // 2
                        for kw in range(KW):
                            tw = dq + kw - pad_w
                            rw, sw = tw % 2, tw // 2
                            key = (rh, rw, sh, sw)
                            if key not in memo:
                                memo[key] = shifted(phase_img[(rh, rw)], sh, sw)
                            r0 = (kh * KW + kw) * C_in
                            p_ref[r0:r0 + C_in, c0:c0 + HW] = memo[key]

        # --- single fused MXU matmul; bias rides in via the folded ones-row ---
        acc = jnp.dot(w_ref[...], p_ref[...], preferred_element_type=jnp.float32)
        o_ref[...] = acc.astype(o_ref.dtype)

    out_flat = pl.pallas_call(
        kernel,
        out_shape=jax.ShapeDtypeStruct((C_out, NL), out_dtype),
        grid_spec=pltpu.PrefetchScalarGridSpec(
            num_scalar_prefetch=0,
            grid=(n_steps,),
            in_specs=[
                pl.BlockSpec((B_blk, C_in, HW), lambda g: (g, 0, 0)),
                pl.BlockSpec((C_out, K_pad), lambda g: (0, 0), **resident_kwargs),
                pl.BlockSpec((2, HW), lambda g: (0, 0), **resident_kwargs),
            ],
            out_specs=pl.BlockSpec((C_out, NLb), lambda g: (0, g)),
            scratch_shapes=[pltpu.VMEM((K_pad, NLb), jnp.float32)],
        ),
        compiler_params=pltpu.CompilerParams(dimension_semantics=dim_sem),
    )(x_flat, w_full, rc)

    # Reassemble the 2x2 output phases into NCHW (one tiny 64 KB transpose + reshapes).
    out = out_flat.reshape(C_out, B, 2, 2, H, W)            # (co, b, dp, dq, a, w)
    out = jnp.transpose(out, (1, 0, 4, 2, 5, 3))            # (b, co, a, dp, w, dq)
    return out.reshape(B, C_out, 2 * H, 2 * W)


if __name__ == "__main__":
    # UpsampleConv2d(in_channels=4, out_channels=8, kernel_size=3), x: (2, 4, 16, 16)
    in_channels, out_channels, kernel_size = 4, 8, 3
    B, H, W = 2, 16, 16

    key = jax.random.PRNGKey(0)
    kx, kw, kb = jax.random.split(key, 3)

    fan_in = in_channels * kernel_size * kernel_size
    bound = 1.0 / (fan_in ** 0.5)
    weight = jax.random.uniform(
        kw, (out_channels, in_channels, kernel_size, kernel_size),
        minval=-bound, maxval=bound, dtype=jnp.float32)
    bias = jax.random.uniform(
        kb, (out_channels,), minval=-bound, maxval=bound, dtype=jnp.float32)
    x = jax.random.normal(kx, (B, in_channels, H, W), dtype=jnp.float32)

    out = jax.block_until_ready(upsample_conv2d_forward(x, weight, bias))

    # Pure-JAX reference: bilinear 2x upsample (align_corners=False) + Conv2d + bias
    x_up_ref = jax.image.resize(x, (B, in_channels, 2 * H, 2 * W), method="bilinear")
    ref = lax.conv_general_dilated(
        x_up_ref, weight, (1, 1),
        [(kernel_size // 2, kernel_size // 2)] * 2,
        dimension_numbers=("NCHW", "OIHW", "NCHW"))
    ref = ref + bias[None, :, None, None]

    assert out.shape == ref.shape, (out.shape, ref.shape)
    assert jnp.allclose(out, ref, atol=1e-4, rtol=1e-4), float(
        jnp.max(jnp.abs(out - ref)))

    print("KERNEL_OK")
</pallas_src>

<mosaic_0001>
module attributes {stable_mosaic.version = 11 : i64} {
  func.func @kernel(%arg0: i32, %arg1: memref<2x4x256xf32, #tpu.memory_space<vmem>>, %arg2: memref<8x40xf32, #tpu.memory_space<vmem>>, %arg3: memref<2x256xi32, #tpu.memory_space<vmem>>, %arg4: memref<8x2048xf32, #tpu.memory_space<vmem>>, %arg5: memref<40x2048xf32, #tpu.memory_space<vmem>>) attributes {dimension_semantics = [#tpu.dimension_semantics<arbitrary>], iteration_bounds = array<i64: 1>, scalar_prefetch = 0 : i64, scratch_operands = 1 : i64, tpu.core_type = #tpu.core_type<tc>, window_params = [{transform_indices = @transform_0, window_bounds = array<i64: 2, 4, 256>}, {pipeline_mode = #tpu.pipeline_mode<synchronous>, transform_indices = @transform_1, window_bounds = array<i64: 8, 40>}, {pipeline_mode = #tpu.pipeline_mode<synchronous>, transform_indices = @transform_2, window_bounds = array<i64: 2, 256>}, {transform_indices = @transform_3, window_bounds = array<i64: 8, 2048>}]} {
    %c0 = arith.constant 0 : index
    %c0_0 = arith.constant 0 : index
    %0 = vector.load %arg3[%c0, %c0_0] : memref<2x256xi32, #tpu.memory_space<vmem>>, vector<1x256xi32>
    %c1 = arith.constant 1 : index
    %c0_1 = arith.constant 0 : index
    %1 = vector.load %arg3[%c1, %c0_1] : memref<2x256xi32, #tpu.memory_space<vmem>>, vector<1x256xi32>
    %cst = arith.constant 1.000000e+00 : f32
    %2 = vector.broadcast %cst : f32 to vector<1x2048xf32>
    %c36 = arith.constant 36 : index
    %c0_2 = arith.constant 0 : index
    %3 = vector.load %arg5[%c36, %c0_2] : memref<40x2048xf32, #tpu.memory_space<vmem>>, vector<1x2048xf32>
    tpu.vector_store %arg5[%c36, %c0_2], %2 {strides = array<i32>} : memref<40x2048xf32, #tpu.memory_space<vmem>>, vector<1x2048xf32>,
    %cst_3 = arith.constant 0.000000e+00 : f32
    %4 = vector.broadcast %cst_3 : f32 to vector<3x2048xf32>
    %c37 = arith.constant 37 : index
    %c0_4 = arith.constant 0 : index
    %5 = vector.load %arg5[%c37, %c0_4] : memref<40x2048xf32, #tpu.memory_space<vmem>>, vector<3x2048xf32>
    tpu.vector_store %arg5[%c37, %c0_4], %4 {strides = array<i32>} : memref<40x2048xf32, #tpu.memory_space<vmem>>, vector<3x2048xf32>,
    %c0_5 = arith.constant 0 : index
    %c0_6 = arith.constant 0 : index
    %c0_7 = arith.constant 0 : index
    %6 = vector.load %arg1[%c0_5, %c0_6, %c0_7] : memref<2x4x256xf32, #tpu.memory_space<vmem>>, vector<1x4x256xf32>
    %7 = vector.shape_cast %6 : vector<1x4x256xf32> to vector<4x256xf32>
    %c0_i32 = arith.constant 0 : i32
    %8 = vector.broadcast %c0_i32 : i32 to vector<1x256xi32>
    %9 = arith.cmpi eq, %0, %8 : vector<1x256xi32>
    %10 = vector.extract_strided_slice %7 {offsets = [0, 240], sizes = [4, 16], strides = [1, 1]} : vector<4x256xf32> to vector<4x16xf32>
    %11 = vector.extract_strided_slice %7 {offsets = [0, 0], sizes = [4, 240], strides = [1, 1]} : vector<4x256xf32> to vector<4x240xf32>
    %12 = tpu.concatenate %10, %11 in 1 : vector<4x16xf32>, vector<4x240xf32> -> vector<4x256xf32>
    %13 = vector.shape_cast %9 : vector<1x256xi1> to vector<1x256xi1>
    %14 = vector.broadcast %13 : vector<1x256xi1> to vector<4x256xi1>
    %15 = arith.select %14, %7, %12 : vector<4x256xi1>, vector<4x256xf32>
    %c15_i32 = arith.constant 15 : i32
    %16 = vector.broadcast %c15_i32 : i32 to vector<1x256xi32>
    %17 = arith.cmpi eq, %0, %16 : vector<1x256xi32>
    %18 = vector.extract_strided_slice %7 {offsets = [0, 16], sizes = [4, 240], strides = [1, 1]} : vector<4x256xf32> to vector<4x240xf32>
    %19 = vector.extract_strided_slice %7 {offsets = [0, 0], sizes = [4, 16], strides = [1, 1]} : vector<4x256xf32> to vector<4x16xf32>
    %20 = tpu.concatenate %18, %19 in 1 : vector<4x240xf32>, vector<4x16xf32> -> vector<4x256xf32>
    %21 = vector.shape_cast %17 : vector<1x256xi1> to vector<1x256xi1>
    %22 = vector.broadcast %21 : vector<1x256xi1> to vector<4x256xi1>
    %23 = arith.select %22, %7, %20 : vector<4x256xi1>, vector<4x256xf32>
    %cst_8 = arith.constant 2.500000e-01 : f32
    %24 = vector.broadcast %cst_8 : f32 to vector<4x256xf32>
    %25 = arith.mulf %24, %15 : vector<4x256xf32>
    %cst_9 = arith.constant 7.500000e-01 : f32
    %26 = vector.broadcast %cst_9 : f32 to vector<4x256xf32>
    %27 = arith.mulf %26, %7 : vector<4x256xf32>
    %28 = arith.addf %25, %27 : vector<4x256xf32>
    %cst_10 = arith.constant 7.500000e-01 : f32
    %29 = vector.broadcast %cst_10 : f32 to vector<4x256xf32>
    %30 = arith.mulf %29, %7 : vector<4x256xf32>
    %cst_11 = arith.constant 2.500000e-01 : f32
    %31 = vector.broadcast %cst_11 : f32 to vector<4x256xf32>
    %32 = arith.mulf %31, %23 : vector<4x256xf32>
    %33 = arith.addf %30, %32 : vector<4x256xf32>
    %c0_i32_12 = arith.constant 0 : i32
    %34 = vector.broadcast %c0_i32_12 : i32 to vector<1x256xi32>
    %35 = arith.cmpi eq, %1, %34 : vector<1x256xi32>
    %36 = vector.extract_strided_slice %28 {offsets = [0, 255], sizes = [4, 1], strides = [1, 1]} : vector<4x256xf32> to vector<4x1xf32>
    %37 = vector.extract_strided_slice %28 {offsets = [0, 0], sizes = [4, 255], strides = [1, 1]} : vector<4x256xf32> to vector<4x255xf32>
    %38 = tpu.concatenate %36, %37 in 1 : vector<4x1xf32>, vector<4x255xf32> -> vector<4x256xf32>
    %39 = vector.shape_cast %35 : vector<1x256xi1> to vector<1x256xi1>
    %40 = vector.broadcast %39 : vector<1x256xi1> to vector<4x256xi1>
    %41 = arith.select %40, %28, %38 : vector<4x256xi1>, vector<4x256xf32>
    %c15_i32_13 = arith.constant 15 : i32
    %42 = vector.broadcast %c15_i32_13 : i32 to vector<1x256xi32>
    %43 = arith.cmpi eq, %1, %42 : vector<1x256xi32>
    %44 = vector.extract_strided_slice %28 {offsets = [0, 1], sizes = [4, 255], strides = [1, 1]} : vector<4x256xf32> to vector<4x255xf32>
    %45 = vector.extract_strided_slice %28 {offsets = [0, 0], sizes = [4, 1], strides = [1, 1]} : vector<4x256xf32> to vector<4x1xf32>
    %46 = tpu.concatenate %44, %45 in 1 : vector<4x255xf32>, vector<4x1xf32> -> vector<4x256xf32>
    %47 = vector.shape_cast %43 : vector<1x256xi1> to vector<1x256xi1>
    %48 = vector.broadcast %47 : vector<1x256xi1> to vector<4x256xi1>
    %49 = arith.select %48, %28, %46 : vector<4x256xi1>, vector<4x256xf32>
    %cst_14 = arith.constant 2.500000e-01 : f32
    %50 = vector.broadcast %cst_14 : f32 to vector<4x256xf32>
    %51 = arith.mulf %50, %41 : vector<4x256xf32>
    %cst_15 = arith.constant 7.500000e-01 : f32
    %52 = vector.broadcast %cst_15 : f32 to vector<4x256xf32>
    %53 = arith.mulf %52, %28 : vector<4x256xf32>
    %54 = arith.addf %51, %53 : vector<4x256xf32>
    %cst_16 = arith.constant 7.500000e-01 : f32
    %55 = vector.broadcast %cst_16 : f32 to vector<4x256xf32>
    %56 = arith.mulf %55, %28 : vector<4x256xf32>
    %cst_17 = arith.constant 2.500000e-01 : f32
    %57 = vector.broadcast %cst_17 : f32 to vector<4x256xf32>
    %58 = arith.mulf %57, %49 : vector<4x256xf32>
    %59 = arith.addf %56, %58 : vector<4x256xf32>
    %c0_i32_18 = arith.constant 0 : i32
    %60 = vector.broadcast %c0_i32_18 : i32 to vector<1x256xi32>
    %61 = arith.cmpi eq, %1, %60 : vector<1x256xi32>
    %62 = vector.extract_strided_slice %33 {offsets = [0, 255], sizes = [4, 1], strides = [1, 1]} : vector<4x256xf32> to vector<4x1xf32>
    %63 = vector.extract_strided_slice %33 {offsets = [0, 0], sizes = [4, 255], strides = [1, 1]} : vector<4x256xf32> to vector<4x255xf32>
    %64 = tpu.concatenate %62, %63 in 1 : vector<4x1xf32>, vector<4x255xf32> -> vector<4x256xf32>
    %65 = vector.shape_cast %61 : vector<1x256xi1> to vector<1x256xi1>
    %66 = vector.broadcast %65 : vector<1x256xi1> to vector<4x256xi1>
    %67 = arith.select %66, %33, %64 : vector<4x256xi1>, vector<4x256xf32>
    %c15_i32_19 = arith.constant 15 : i32
    %68 = vector.broadcast %c15_i32_19 : i32 to vector<1x256xi32>
    %69 = arith.cmpi eq, %1, %68 : vector<1x256xi32>
    %70 = vector.extract_strided_slice %33 {offsets = [0, 1], sizes = [4, 255], strides = [1, 1]} : vector<4x256xf32> to vector<4x255xf32>
    %71 = vector.extract_strided_slice %33 {offsets = [0, 0], sizes = [4, 1], strides = [1, 1]} : vector<4x256xf32> to vector<4x1xf32>
    %72 = tpu.concatenate %70, %71 in 1 : vector<4x255xf32>, vector<4x1xf32> -> vector<4x256xf32>
    %73 = vector.shape_cast %69 : vector<1x256xi1> to vector<1x256xi1>
    %74 = vector.broadcast %73 : vector<1x256xi1> to vector<4x256xi1>
    %75 = arith.select %74, %33, %72 : vector<4x256xi1>, vector<4x256xf32>
    %cst_20 = arith.constant 2.500000e-01 : f32
    %76 = vector.broadcast %cst_20 : f32 to vector<4x256xf32>
    %77 = arith.mulf %76, %67 : vector<4x256xf32>
    %cst_21 = arith.constant 7.500000e-01 : f32
    %78 = vector.broadcast %cst_21 : f32 to vector<4x256xf32>
    %79 = arith.mulf %78, %33 : vector<4x256xf32>
    %80 = arith.addf %77, %79 : vector<4x256xf32>
    %cst_22 = arith.constant 7.500000e-01 : f32
    %81 = vector.broadcast %cst_22 : f32 to vector<4x256xf32>
    %82 = arith.mulf %81, %33 : vector<4x256xf32>
    %cst_23 = arith.constant 2.500000e-01 : f32
    %83 = vector.broadcast %cst_23 : f32 to vector<4x256xf32>
    %84 = arith.mulf %83, %75 : vector<4x256xf32>
    %85 = arith.addf %82, %84 : vector<4x256xf32>
    %86 = vector.extract_strided_slice %85 {offsets = [0, 239], sizes = [4, 17], strides = [1, 1]} : vector<4x256xf32> to vector<4x17xf32>
    %87 = vector.extract_strided_slice %85 {offsets = [0, 0], sizes = [4, 239], strides = [1, 1]} : vector<4x256xf32> to vector<4x239xf32>
    %88 = tpu.concatenate %86, %87 in 1 : vector<4x17xf32>, vector<4x239xf32> -> vector<4x256xf32>
    %c1_i32 = arith.constant 1 : i32
    %89 = vector.broadcast %c1_i32 : i32 to vector<1x256xi32>
    %90 = arith.cmpi slt, %0, %89 : vector<1x256xi32>
    %cst_24 = arith.constant 0.000000e+00 : f32
    %91 = vector.shape_cast %90 : vector<1x256xi1> to vector<1x256xi1>
    %92 = vector.broadcast %91 : vector<1x256xi1> to vector<4x256xi1>
    %93 = vector.broadcast %cst_24 : f32 to vector<4x256xf32>
    %94 = arith.select %92, %93, %88 : vector<4x256xi1>, vector<4x256xf32>
    %c1_i32_25 = arith.constant 1 : i32
    %95 = vector.broadcast %c1_i32_25 : i32 to vector<1x256xi32>
    %96 = arith.cmpi slt, %1, %95 : vector<1x256xi32>
    %cst_26 = arith.constant 0.000000e+00 : f32
    %97 = vector.shape_cast %96 : vector<1x256xi1> to vector<1x256xi1>
    %98 = vector.broadcast %97 : vector<1x256xi1> to vector<4x256xi1>
    %99 = vector.broadcast %cst_26 : f32 to vector<4x256xf32>
    %100 = arith.select %98, %99, %94 : vector<4x256xi1>, vector<4x256xf32>
    %c0_27 = arith.constant 0 : index
    %c0_28 = arith.constant 0 : index
    %101 = vector.load %arg5[%c0_27, %c0_28] : memref<40x2048xf32, #tpu.memory_space<vmem>>, vector<4x256xf32>
    tpu.vector_store %arg5[%c0_27, %c0_28], %100 {strides = array<i32>} : memref<40x2048xf32, #tpu.memory_space<vmem>>, vector<4x256xf32>,
    %102 = vector.extract_strided_slice %80 {offsets = [0, 240], sizes = [4, 16], strides = [1, 1]} : vector<4x256xf32> to vector<4x16xf32>
    %103 = vector.extract_strided_slice %80 {offsets = [0, 0], sizes = [4, 240], strides = [1, 1]} : vector<4x256xf32> to vector<4x240xf32>
    %104 = tpu.concatenate %102, %103 in 1 : vector<4x16xf32>, vector<4x240xf32> -> vector<4x256xf32>
    %c1_i32_29 = arith.constant 1 : i32
    %105 = vector.broadcast %c1_i32_29 : i32 to vector<1x256xi32>
    %106 = arith.cmpi slt, %0, %105 : vector<1x256xi32>
    %cst_30 = arith.constant 0.000000e+00 : f32
    %107 = vector.shape_cast %106 : vector<1x256xi1> to vector<1x256xi1>
    %108 = vector.broadcast %107 : vector<1x256xi1> to vector<4x256xi1>
    %109 = vector.broadcast %cst_30 : f32 to vector<4x256xf32>
    %110 = arith.select %108, %109, %104 : vector<4x256xi1>, vector<4x256xf32>
    %c4 = arith.constant 4 : index
    %c0_31 = arith.constant 0 : index
    %111 = vector.load %arg5[%c4, %c0_31] : memref<40x2048xf32, #tpu.memory_space<vmem>>, vector<4x256xf32>
    tpu.vector_store %arg5[%c4, %c0_31], %110 {strides = array<i32>} : memref<40x2048xf32, #tpu.memory_space<vmem>>, vector<4x256xf32>,
    %112 = vector.extract_strided_slice %85 {offsets = [0, 240], sizes = [4, 16], strides = [1, 1]} : vector<4x256xf32> to vector<4x16xf32>
    %113 = vector.extract_strided_slice %85 {offsets = [0, 0], sizes = [4, 240], strides = [1, 1]} : vector<4x256xf32> to vector<4x240xf32>
    %114 = tpu.concatenate %112, %113 in 1 : vector<4x16xf32>, vector<4x240xf32> -> vector<4x256xf32>
    %c1_i32_32 = arith.constant 1 : i32
    %115 = vector.broadcast %c1_i32_32 : i32 to vector<1x256xi32>
    %116 = arith.cmpi slt, %0, %115 : vector<1x256xi32>
    %cst_33 = arith.constant 0.000000e+00 : f32
    %117 = vector.shape_cast %116 : vector<1x256xi1> to vector<1x256xi1>
    %118 = vector.broadcast %117 : vector<1x256xi1> to vector<4x256xi1>
    %119 = vector.broadcast %cst_33 : f32 to vector<4x256xf32>
    %120 = arith.select %118, %119, %114 : vector<4x256xi1>, vector<4x256xf32>
    %c8 = arith.constant 8 : index
    %c0_34 = arith.constant 0 : index
    %121 = vector.load %arg5[%c8, %c0_34] : memref<40x2048xf32, #tpu.memory_space<vmem>>, vector<4x256xf32>
    tpu.vector_store %arg5[%c8, %c0_34], %120 {strides = array<i32>} : memref<40x2048xf32, #tpu.memory_space<vmem>>, vector<4x256xf32>,
    %122 = vector.extract_strided_slice %59 {offsets = [0, 255], sizes = [4, 1], strides = [1, 1]} : vector<4x256xf32> to vector<4x1xf32>
    %123 = vector.extract_strided_slice %59 {offsets = [0, 0], sizes = [4, 255], strides = [1, 1]} : vector<4x256xf32> to vector<4x255xf32>
    %124 = tpu.concatenate %122, %123 in 1 : vector<4x1xf32>, vector<4x255xf32> -> vector<4x256xf32>
    %c1_i32_35 = arith.constant 1 : i32
    %125 = vector.broadcast %c1_i32_35 : i32 to vector<1x256xi32>
    %126 = arith.cmpi slt, %1, %125 : vector<1x256xi32>
    %cst_36 = arith.constant 0.000000e+00 : f32
    %127 = vector.shape_cast %126 : vector<1x256xi1> to vector<1x256xi1>
    %128 = vector.broadcast %127 : vector<1x256xi1> to vector<4x256xi1>
    %129 = vector.broadcast %cst_36 : f32 to vector<4x256xf32>
    %130 = arith.select %128, %129, %124 : vector<4x256xi1>, vector<4x256xf32>
    %c12 = arith.constant 12 : index
    %c0_37 = arith.constant 0 : index
    %131 = vector.load %arg5[%c12, %c0_37] : memref<40x2048xf32, #tpu.memory_space<vmem>>, vector<4x256xf32>
    tpu.vector_store %arg5[%c12, %c0_37], %130 {strides = array<i32>} : memref<40x2048xf32, #tpu.memory_space<vmem>>, vector<4x256xf32>,
    %c16 = arith.constant 16 : index
    %c0_38 = arith.constant 0 : index
    %132 = vector.load %arg5[%c16, %c0_38] : memref<40x2048xf32, #tpu.memory_space<vmem>>, vector<4x256xf32>
    tpu.vector_store %arg5[%c16, %c0_38], %54 {strides = array<i32>} : memref<40x2048xf32, #tpu.memory_space<vmem>>, vector<4x256xf32>,
    %c20 = arith.constant 20 : index
    %c0_39 = arith.constant 0 : index
    %133 = vector.load %arg5[%c20, %c0_39] : memref<40x2048xf32, #tpu.memory_space<vmem>>, vector<4x256xf32>
    tpu.vector_store %arg5[%c20, %c0_39], %59 {strides = array<i32>} : memref<40x2048xf32, #tpu.memory_space<vmem>>, vector<4x256xf32>,
    %134 = vector.extract_strided_slice %85 {offsets = [0, 255], sizes = [4, 1], strides = [1, 1]} : vector<4x256xf32> to vector<4x1xf32>
    %135 = vector.extract_strided_slice %85 {offsets = [0, 0], sizes = [4, 255], strides = [1, 1]} : vector<4x256xf32> to vector<4x255xf32>
    %136 = tpu.concatenate %134, %135 in 1 : vector<4x1xf32>, vector<4x255xf32> -> vector<4x256xf32>
    %c1_i32_40 = arith.constant 1 : i32
    %137 = vector.broadcast %c1_i32_40 : i32 to vector<1x256xi32>
    %138 = arith.cmpi slt, %1, %137 : vector<1x256xi32>
    %cst_41 = arith.constant 0.000000e+00 : f32
    %139 = vector.shape_cast %138 : vector<1x256xi1> to vector<1x256xi1>
    %140 = vector.broadcast %139 : vector<1x256xi1> to vector<4x256xi1>
    %141 = vector.broadcast %cst_41 : f32 to vector<4x256xf32>
    %142 = arith.select %140, %141, %136 : vector<4x256xi1>, vector<4x256xf32>
    %c24 = arith.constant 24 : index
    %c0_42 = arith.constant 0 : index
    %143 = vector.load %arg5[%c24, %c0_42] : memref<40x2048xf32, #tpu.memory_space<vmem>>, vector<4x256xf32>
    tpu.vector_store %arg5[%c24, %c0_42], %142 {strides = array<i32>} : memref<40x2048xf32, #tpu.memory_space<vmem>>, vector<4x256xf32>,
    %c28 = arith.constant 28 : index
    %c0_43 = arith.constant 0 : index
    %144 = vector.load %arg5[%c28, %c0_43] : memref<40x2048xf32, #tpu.memory_space<vmem>>, vector<4x256xf32>
    tpu.vector_store %arg5[%c28, %c0_43], %80 {strides = array<i32>} : memref<40x2048xf32, #tpu.memory_space<vmem>>, vector<4x256xf32>,
    %c32 = arith.constant 32 : index
    %c0_44 = arith.constant 0 : index
    %145 = vector.load %arg5[%c32, %c0_44] : memref<40x2048xf32, #tpu.memory_space<vmem>>, vector<4x256xf32>
    tpu.vector_store %arg5[%c32, %c0_44], %85 {strides = array<i32>} : memref<40x2048xf32, #tpu.memory_space<vmem>>, vector<4x256xf32>,
    %c0_45 = arith.constant 0 : index
    %c256 = arith.constant 256 : index
    %146 = vector.load %arg5[%c0_45, %c256] : memref<40x2048xf32, #tpu.memory_space<vmem>>, vector<4x256xf32>
    tpu.vector_store %arg5[%c0_45, %c256], %110 {strides = array<i32>} : memref<40x2048xf32, #tpu.memory_space<vmem>>, vector<4x256xf32>,
    %c4_46 = arith.constant 4 : index
    %c256_47 = arith.constant 256 : index
    %147 = vector.load %arg5[%c4_46, %c256_47] : memref<40x2048xf32, #tpu.memory_space<vmem>>, vector<4x256xf32>
    tpu.vector_store %arg5[%c4_46, %c256_47], %120 {strides = array<i32>} : memref<40x2048xf32, #tpu.memory_space<vmem>>, vector<4x256xf32>,
    %148 = vector.extract_strided_slice %80 {offsets = [0, 241], sizes = [4, 15], strides = [1, 1]} : vector<4x256xf32> to vector<4x15xf32>
    %149 = vector.extract_strided_slice %80 {offsets = [0, 0], sizes = [4, 241], strides = [1, 1]} : vector<4x256xf32> to vector<4x241xf32>
    %150 = tpu.concatenate %148, %149 in 1 : vector<4x15xf32>, vector<4x241xf32> -> vector<4x256xf32>
    %c1_i32_48 = arith.constant 1 : i32
    %151 = vector.broadcast %c1_i32_48 : i32 to vector<1x256xi32>
    %152 = arith.cmpi slt, %0, %151 : vector<1x256xi32>
    %cst_49 = arith.constant 0.000000e+00 : f32
    %153 = vector.shape_cast %152 : vector<1x256xi1> to vector<1x256xi1>
    %154 = vector.broadcast %153 : vector<1x256xi1> to vector<4x256xi1>
    %155 = vector.broadcast %cst_49 : f32 to vector<4x256xf32>
    %156 = arith.select %154, %155, %150 : vector<4x256xi1>, vector<4x256xf32>
    %c15_i32_50 = arith.constant 15 : i32
    %157 = vector.broadcast %c15_i32_50 : i32 to vector<1x256xi32>
    %158 = arith.cmpi sge, %1, %157 : vector<1x256xi32>
    %cst_51 = arith.constant 0.000000e+00 : f32
    %159 = vector.shape_cast %158 : vector<1x256xi1> to vector<1x256xi1>
    %160 = vector.broadcast %159 : vector<1x256xi1> to vector<4x256xi1>
    %161 = vector.broadcast %cst_51 : f32 to vector<4x256xf32>
    %162 = arith.select %160, %161, %156 : vector<4x256xi1>, vector<4x256xf32>
    %c8_52 = arith.constant 8 : index
    %c256_53 = arith.constant 256 : index
    %163 = vector.load %arg5[%c8_52, %c256_53] : memref<40x2048xf32, #tpu.memory_space<vmem>>, vector<4x256xf32>
    tpu.vector_store %arg5[%c8_52, %c256_53], %162 {strides = array<i32>} : memref<40x2048xf32, #tpu.memory_space<vmem>>, vector<4x256xf32>,
    %c12_54 = arith.constant 12 : index
    %c256_55 = arith.constant 256 : index
    %164 = vector.load %arg5[%c12_54, %c256_55] : memref<40x2048xf32, #tpu.memory_space<vmem>>, vector<4x256xf32>
    tpu.vector_store %arg5[%c12_54, %c256_55], %54 {strides = array<i32>} : memref<40x2048xf32, #tpu.memory_space<vmem>>, vector<4x256xf32>,
    %c16_56 = arith.constant 16 : index
    %c256_57 = arith.constant 256 : index
    %165 = vector.load %arg5[%c16_56, %c256_57] : memref<40x2048xf32, #tpu.memory_space<vmem>>, vector<4x256xf32>
    tpu.vector_store %arg5[%c16_56, %c256_57], %59 {strides = array<i32>} : memref<40x2048xf32, #tpu.memory_space<vmem>>, vector<4x256xf32>,
    %166 = vector.extract_strided_slice %54 {offsets = [0, 1], sizes = [4, 255], strides = [1, 1]} : vector<4x256xf32> to vector<4x255xf32>
    %167 = vector.extract_strided_slice %54 {offsets = [0, 0], sizes = [4, 1], strides = [1, 1]} : vector<4x256xf32> to vector<4x1xf32>
    %168 = tpu.concatenate %166, %167 in 1 : vector<4x255xf32>, vector<4x1xf32> -> vector<4x256xf32>
    %c15_i32_58 = arith.constant 15 : i32
    %169 = vector.broadcast %c15_i32_58 : i32 to vector<1x256xi32>
    %170 = arith.cmpi sge, %1, %169 : vector<1x256xi32>
    %cst_59 = arith.constant 0.000000e+00 : f32
    %171 = vector.shape_cast %170 : vector<1x256xi1> to vector<1x256xi1>
    %172 = vector.broadcast %171 : vector<1x256xi1> to vector<4x256xi1>
    %173 = vector.broadcast %cst_59 : f32 to vector<4x256xf32>
    %174 = arith.select %172, %173, %168 : vector<4x256xi1>, vector<4x256xf32>
    %c20_60 = arith.constant 20 : index
    %c256_61 = arith.constant 256 : index
    %175 = vector.load %arg5[%c20_60, %c256_61] : memref<40x2048xf32, #tpu.memory_space<vmem>>, vector<4x256xf32>
    tpu.vector_store %arg5[%c20_60, %c256_61], %174 {strides = array<i32>} : memref<40x2048xf32, #tpu.memory_space<vmem>>, vector<4x256xf32>,
    %c24_62 = arith.constant 24 : index
    %c256_63 = arith.constant 256 : index
    %176 = vector.load %arg5[%c24_62, %c256_63] : memref<40x2048xf32, #tpu.memory_space<vmem>>, vector<4x256xf32>
    tpu.vector_store %arg5[%c24_62, %c256_63], %80 {strides = array<i32>} : memref<40x2048xf32, #tpu.memory_space<vmem>>, vector<4x256xf32>,
    %c28_64 = arith.constant 28 : index
    %c256_65 = arith.constant 256 : index
    %177 = vector.load %arg5[%c28_64, %c256_65] : memref<40x2048xf32, #tpu.memory_space<vmem>>, vector<4x256xf32>
    tpu.vector_store %arg5[%c28_64, %c256_65], %85 {strides = array<i32>} : memref<40x2048xf32, #tpu.memory_space<vmem>>, vector<4x256xf32>,
    %178 = vector.extract_strided_slice %80 {offsets = [0, 1], sizes = [4, 255], strides = [1, 1]} : vector<4x256xf32> to vector<4x255xf32>
    %179 = vector.extract_strided_slice %80 {offsets = [0, 0], sizes = [4, 1], strides = [1, 1]} : vector<4x256xf32> to vector<4x1xf32>
    %180 = tpu.concatenate %178, %179 in 1 : vector<4x255xf32>, vector<4x1xf32> -> vector<4x256xf32>
    %c15_i32_66 = arith.constant 15 : i32
    %181 = vector.broadcast %c15_i32_66 : i32 to vector<1x256xi32>
    %182 = arith.cmpi sge, %1, %181 : vector<1x256xi32>
    %cst_67 = arith.constant 0.000000e+00 : f32
    %183 = vector.shape_cast %182 : vector<1x256xi1> to vector<1x256xi1>
    %184 = vector.broadcast %183 : vector<1x256xi1> to vector<4x256xi1>
    %185 = vector.broadcast %cst_67 : f32 to vector<4x256xf32>
    %186 = arith.select %184, %185, %180 : vector<4x256xi1>, vector<4x256xf32>
    %c32_68 = arith.constant 32 : index
    %c256_69 = arith.constant 256 : index
    %187 = vector.load %arg5[%c32_68, %c256_69] : memref<40x2048xf32, #tpu.memory_space<vmem>>, vector<4x256xf32>
    tpu.vector_store %arg5[%c32_68, %c256_69], %186 {strides = array<i32>} : memref<40x2048xf32, #tpu.memory_space<vmem>>, vector<4x256xf32>,
    %c0_70 = arith.constant 0 : index
    %c512 = arith.constant 512 : index
    %188 = vector.load %arg5[%c0_70, %c512] : memref<40x2048xf32, #tpu.memory_space<vmem>>, vector<4x256xf32>
    tpu.vector_store %arg5[%c0_70, %c512], %130 {strides = array<i32>} : memref<40x2048xf32, #tpu.memory_space<vmem>>, vector<4x256xf32>,
    %c4_71 = arith.constant 4 : index
    %c512_72 = arith.constant 512 : index
    %189 = vector.load %arg5[%c4_71, %c512_72] : memref<40x2048xf32, #tpu.memory_space<vmem>>, vector<4x256xf32>
    tpu.vector_store %arg5[%c4_71, %c512_72], %54 {strides = array<i32>} : memref<40x2048xf32, #tpu.memory_space<vmem>>, vector<4x256xf32>,
    %c8_73 = arith.constant 8 : index
    %c512_74 = arith.constant 512 : index
    %190 = vector.load %arg5[%c8_73, %c512_74] : memref<40x2048xf32, #tpu.memory_space<vmem>>, vector<4x256xf32>
    tpu.vector_store %arg5[%c8_73, %c512_74], %59 {strides = array<i32>} : memref<40x2048xf32, #tpu.memory_space<vmem>>, vector<4x256xf32>,
    %c12_75 = arith.constant 12 : index
    %c512_76 = arith.constant 512 : index
    %191 = vector.load %arg5[%c12_75, %c512_76] : memref<40x2048xf32, #tpu.memory_space<vmem>>, vector<4x256xf32>
    tpu.vector_store %arg5[%c12_75, %c512_76], %142 {strides = array<i32>} : memref<40x2048xf32, #tpu.memory_space<vmem>>, vector<4x256xf32>,
    %c16_77 = arith.constant 16 : index
    %c512_78 = arith.constant 512 : index
    %192 = vector.load %arg5[%c16_77, %c512_78] : memref<40x2048xf32, #tpu.memory_space<vmem>>, vector<4x256xf32>
    tpu.vector_store %arg5[%c16_77, %c512_78], %80 {strides = array<i32>} : memref<40x2048xf32, #tpu.memory_space<vmem>>, vector<4x256xf32>,
    %c20_79 = arith.constant 20 : index
    %c512_80 = arith.constant 512 : index
    %193 = vector.load %arg5[%c20_79, %c512_80] : memref<40x2048xf32, #tpu.memory_space<vmem>>, vector<4x256xf32>
    tpu.vector_store %arg5[%c20_79, %c512_80], %85 {strides = array<i32>} : memref<40x2048xf32, #tpu.memory_space<vmem>>, vector<4x256xf32>,
    %194 = vector.extract_strided_slice %59 {offsets = [0, 15], sizes = [4, 241], strides = [1, 1]} : vector<4x256xf32> to vector<4x241xf32>
    %195 = vector.extract_strided_slice %59 {offsets = [0, 0], sizes = [4, 15], strides = [1, 1]} : vector<4x256xf32> to vector<4x15xf32>
    %196 = tpu.concatenate %194, %195 in 1 : vector<4x241xf32>, vector<4x15xf32> -> vector<4x256xf32>
    %c15_i32_81 = arith.constant 15 : i32
    %197 = vector.broadcast %c15_i32_81 : i32 to vector<1x256xi32>
    %198 = arith.cmpi sge, %0, %197 : vector<1x256xi32>
    %cst_82 = arith.constant 0.000000e+00 : f32
    %199 = vector.shape_cast %198 : vector<1x256xi1> to vector<1x256xi1>
    %200 = vector.broadcast %199 : vector<1x256xi1> to vector<4x256xi1>
    %201 = vector.broadcast %cst_82 : f32 to vector<4x256xf32>
    %202 = arith.select %200, %201, %196 : vector<4x256xi1>, vector<4x256xf32>
    %c1_i32_83 = arith.constant 1 : i32
    %203 = vector.broadcast %c1_i32_83 : i32 to vector<1x256xi32>
    %204 = arith.cmpi slt, %1, %203 : vector<1x256xi32>
    %cst_84 = arith.constant 0.000000e+00 : f32
    %205 = vector.shape_cast %204 : vector<1x256xi1> to vector<1x256xi1>
    %206 = vector.broadcast %205 : vector<1x256xi1> to vector<4x256xi1>
    %207 = vector.broadcast %cst_84 : f32 to vector<4x256xf32>
    %208 = arith.select %206, %207, %202 : vector<4x256xi1>, vector<4x256xf32>
    %c24_85 = arith.constant 24 : index
    %c512_86 = arith.constant 512 : index
    %209 = vector.load %arg5[%c24_85, %c512_86] : memref<40x2048xf32, #tpu.memory_space<vmem>>, vector<4x256xf32>
    tpu.vector_store %arg5[%c24_85, %c512_86], %208 {strides = array<i32>} : memref<40x2048xf32, #tpu.memory_space<vmem>>, vector<4x256xf32>,
    %210 = vector.extract_strided_slice %54 {offsets = [0, 16], sizes = [4, 240], strides = [1, 1]} : vector<4x256xf32> to vector<4x240xf32>
    %211 = vector.extract_strided_slice %54 {offsets = [0, 0], sizes = [4, 16], strides = [1, 1]} : vector<4x256xf32> to vector<4x16xf32>
    %212 = tpu.concatenate %210, %211 in 1 : vector<4x240xf32>, vector<4x16xf32> -> vector<4x256xf32>
    %c15_i32_87 = arith.constant 15 : i32
    %213 = vector.broadcast %c15_i32_87 : i32 to vector<1x256xi32>
    %214 = arith.cmpi sge, %0, %213 : vector<1x256xi32>
    %cst_88 = arith.constant 0.000000e+00 : f32
    %215 = vector.shape_cast %214 : vector<1x256xi1> to vector<1x256xi1>
    %216 = vector.broadcast %215 : vector<1x256xi1> to vector<4x256xi1>
    %217 = vector.broadcast %cst_88 : f32 to vector<4x256xf32>
    %218 = arith.select %216, %217, %212 : vector<4x256xi1>, vector<4x256xf32>
    %c28_89 = arith.constant 28 : index
    %c512_90 = arith.constant 512 : index
    %219 = vector.load %arg5[%c28_89, %c512_90] : memref<40x2048xf32, #tpu.memory_space<vmem>>, vector<4x256xf32>
    tpu.vector_store %arg5[%c28_89, %c512_90], %218 {strides = array<i32>} : memref<40x2048xf32, #tpu.memory_space<vmem>>, vector<4x256xf32>,
    %220 = vector.extract_strided_slice %59 {offsets = [0, 16], sizes = [4, 240], strides = [1, 1]} : vector<4x256xf32> to vector<4x240xf32>
    %221 = vector.extract_strided_slice %59 {offsets = [0, 0], sizes = [4, 16], strides = [1, 1]} : vector<4x256xf32> to vector<4x16xf32>
    %222 = tpu.concatenate %220, %221 in 1 : vector<4x240xf32>, vector<4x16xf32> -> vector<4x256xf32>
    %c15_i32_91 = arith.constant 15 : i32
    %223 = vector.broadcast %c15_i32_91 : i32 to vector<1x256xi32>
    %224 = arith.cmpi sge, %0, %223 : vector<1x256xi32>
    %cst_92 = arith.constant 0.000000e+00 : f32
    %225 = vector.shape_cast %224 : vector<1x256xi1> to vector<1x256xi1>
    %226 = vector.broadcast %225 : vector<1x256xi1> to vector<4x256xi1>
    %227 = vector.broadcast %cst_92 : f32 to vector<4x256xf32>
    %228 = arith.select %226, %227, %222 : vector<4x256xi1>, vector<4x256xf32>
    %c32_93 = arith.constant 32 : index
    %c512_94 = arith.constant 512 : index
    %229 = vector.load %arg5[%c32_93, %c512_94] : memref<40x2048xf32, #tpu.memory_space<vmem>>, vector<4x256xf32>
    tpu.vector_store %arg5[%c32_93, %c512_94], %228 {strides = array<i32>} : memref<40x2048xf32, #tpu.memory_space<vmem>>, vector<4x256xf32>,
    %c0_95 = arith.constant 0 : index
    %c768 = arith.constant 768 : index
    %230 = vector.load %arg5[%c0_95, %c768] : memref<40x2048xf32, #tpu.memory_space<vmem>>, vector<4x256xf32>
    tpu.vector_store %arg5[%c0_95, %c768], %54 {strides = array<i32>} : memref<40x2048xf32, #tpu.memory_space<vmem>>, vector<4x256xf32>,
    %c4_96 = arith.constant 4 : index
    %c768_97 = arith.constant 768 : index
    %231 = vector.load %arg5[%c4_96, %c768_97] : memref<40x2048xf32, #tpu.memory_space<vmem>>, vector<4x256xf32>
    tpu.vector_store %arg5[%c4_96, %c768_97], %59 {strides = array<i32>} : memref<40x2048xf32, #tpu.memory_space<vmem>>, vector<4x256xf32>,
    %c8_98 = arith.constant 8 : index
    %c768_99 = arith.constant 768 : index
    %232 = vector.load %arg5[%c8_98, %c768_99] : memref<40x2048xf32, #tpu.memory_space<vmem>>, vector<4x256xf32>
    tpu.vector_store %arg5[%c8_98, %c768_99], %174 {strides = array<i32>} : memref<40x2048xf32, #tpu.memory_space<vmem>>, vector<4x256xf32>,
    %c12_100 = arith.constant 12 : index
    %c768_101 = arith.constant 768 : index
    %233 = vector.load %arg5[%c12_100, %c768_101] : memref<40x2048xf32, #tpu.memory_space<vmem>>, vector<4x256xf32>
    tpu.vector_store %arg5[%c12_100, %c768_101], %80 {strides = array<i32>} : memref<40x2048xf32, #tpu.memory_space<vmem>>, vector<4x256xf32>,
    %c16_102 = arith.constant 16 : index
    %c768_103 = arith.constant 768 : index
    %234 = vector.load %arg5[%c16_102, %c768_103] : memref<40x2048xf32, #tpu.memory_space<vmem>>, vector<4x256xf32>
    tpu.vector_store %arg5[%c16_102, %c768_103], %85 {strides = array<i32>} : memref<40x2048xf32, #tpu.memory_space<vmem>>, vector<4x256xf32>,
    %c20_104 = arith.constant 20 : index
    %c768_105 = arith.constant 768 : index
    %235 = vector.load %arg5[%c20_104, %c768_105] : memref<40x2048xf32, #tpu.memory_space<vmem>>, vector<4x256xf32>
    tpu.vector_store %arg5[%c20_104, %c768_105], %186 {strides = array<i32>} : memref<40x2048xf32, #tpu.memory_space<vmem>>, vector<4x256xf32>,
    %c24_106 = arith.constant 24 : index
    %c768_107 = arith.constant 768 : index
    %236 = vector.load %arg5[%c24_106, %c768_107] : memref<40x2048xf32, #tpu.memory_space<vmem>>, vector<4x256xf32>
    tpu.vector_store %arg5[%c24_106, %c768_107], %218 {strides = array<i32>} : memref<40x2048xf32, #tpu.memory_space<vmem>>, vector<4x256xf32>,
    %c28_108 = arith.constant 28 : index
    %c768_109 = arith.constant 768 : index
    %237 = vector.load %arg5[%c28_108, %c768_109] : memref<40x2048xf32, #tpu.memory_space<vmem>>, vector<4x256xf32>
    tpu.vector_store %arg5[%c28_108, %c768_109], %228 {strides = array<i32>} : memref<40x2048xf32, #tpu.memory_space<vmem>>, vector<4x256xf32>,
    %238 = vector.extract_strided_slice %54 {offsets = [0, 17], sizes = [4, 239], strides = [1, 1]} : vector<4x256xf32> to vector<4x239xf32>
    %239 = vector.extract_strided_slice %54 {offsets = [0, 0], sizes = [4, 17], strides = [1, 1]} : vector<4x256xf32> to vector<4x17xf32>
    %240 = tpu.concatenate %238, %239 in 1 : vector<4x239xf32>, vector<4x17xf32> -> vector<4x256xf32>
    %c15_i32_110 = arith.constant 15 : i32
    %241 = vector.broadcast %c15_i32_110 : i32 to vector<1x256xi32>
    %242 = arith.cmpi sge, %0, %241 : vector<1x256xi32>
    %cst_111 = arith.constant 0.000000e+00 : f32
    %243 = vector.shape_cast %242 : vector<1x256xi1> to vector<1x256xi1>
    %244 = vector.broadcast %243 : vector<1x256xi1> to vector<4x256xi1>
    %245 = vector.broadcast %cst_111 : f32 to vector<4x256xf32>
    %246 = arith.select %244, %245, %240 : vector<4x256xi1>, vector<4x256xf32>
    %c15_i32_112 = arith.constant 15 : i32
    %247 = vector.broadcast %c15_i32_112 : i32 to vector<1x256xi32>
    %248 = arith.cmpi sge, %1, %247 : vector<1x256xi32>
    %cst_113 = arith.constant 0.000000e+00 : f32
    %249 = vector.shape_cast %248 : vector<1x256xi1> to vector<1x256xi1>
    %250 = vector.broadcast %249 : vector<1x256xi1> to vector<4x256xi1>
    %251 = vector.broadcast %cst_113 : f32 to vector<4x256xf32>
    %252 = arith.select %250, %251, %246 : vector<4x256xi1>, vector<4x256xf32>
    %c32_114 = arith.constant 32 : index
    %c768_115 = arith.constant 768 : index
    %253 = vector.load %arg5[%c32_114, %c768_115] : memref<40x2048xf32, #tpu.memory_space<vmem>>, vector<4x256xf32>
    tpu.vector_store %arg5[%c32_114, %c768_115], %252 {strides = array<i32>} : memref<40x2048xf32, #tpu.memory_space<vmem>>, vector<4x256xf32>,
    %c1_116 = arith.constant 1 : index
    %c0_117 = arith.constant 0 : index
    %c0_118 = arith.constant 0 : index
    %254 = vector.load %arg1[%c1_116, %c0_117, %c0_118] : memref<2x4x256xf32, #tpu.memory_space<vmem>>, vector<1x4x256xf32>
    %255 = vector.shape_cast %254 : vector<1x4x256xf32> to vector<4x256xf32>
    %c0_i32_119 = arith.constant 0 : i32
    %256 = vector.broadcast %c0_i32_119 : i32 to vector<1x256xi32>
    %257 = arith.cmpi eq, %0, %256 : vector<1x256xi32>
    %258 = vector.extract_strided_slice %255 {offsets = [0, 240], sizes = [4, 16], strides = [1, 1]} : vector<4x256xf32> to vector<4x16xf32>
    %259 = vector.extract_strided_slice %255 {offsets = [0, 0], sizes = [4, 240], strides = [1, 1]} : vector<4x256xf32> to vector<4x240xf32>
    %260 = tpu.concatenate %258, %259 in 1 : vector<4x16xf32>, vector<4x240xf32> -> vector<4x256xf32>
    %261 = vector.shape_cast %257 : vector<1x256xi1> to vector<1x256xi1>
    %262 = vector.broadcast %261 : vector<1x256xi1> to vector<4x256xi1>
    %263 = arith.select %262, %255, %260 : vector<4x256xi1>, vector<4x256xf32>
    %c15_i32_120 = arith.constant 15 : i32
    %264 = vector.broadcast %c15_i32_120 : i32 to vector<1x256xi32>
    %265 = arith.cmpi eq, %0, %264 : vector<1x256xi32>
    %266 = vector.extract_strided_slice %255 {offsets = [0, 16], sizes = [4, 240], strides = [1, 1]} : vector<4x256xf32> to vector<4x240xf32>
    %267 = vector.extract_strided_slice %255 {offsets = [0, 0], sizes = [4, 16], strides = [1, 1]} : vector<4x256xf32> to vector<4x16xf32>
    %268 = tpu.concatenate %266, %267 in 1 : vector<4x240xf32>, vector<4x16xf32> -> vector<4x256xf32>
    %269 = vector.shape_cast %265 : vector<1x256xi1> to vector<1x256xi1>
    %270 = vector.broadcast %269 : vector<1x256xi1> to vector<4x256xi1>
    %271 = arith.select %270, %255, %268 : vector<4x256xi1>, vector<4x256xf32>
    %cst_121 = arith.constant 2.500000e-01 : f32
    %272 = vector.broadcast %cst_121 : f32 to vector<4x256xf32>
    %273 = arith.mulf %272, %263 : vector<4x256xf32>
    %cst_122 = arith.constant 7.500000e-01 : f32
    %274 = vector.broadcast %cst_122 : f32 to vector<4x256xf32>
    %275 = arith.mulf %274, %255 : vector<4x256xf32>
    %276 = arith.addf %273, %275 : vector<4x256xf32>
    %cst_123 = arith.constant 7.500000e-01 : f32
    %277 = vector.broadcast %cst_123 : f32 to vector<4x256xf32>
    %278 = arith.mulf %277, %255 : vector<4x256xf32>
    %cst_124 = arith.constant 2.500000e-01 : f32
    %279 = vector.broadcast %cst_124 : f32 to vector<4x256xf32>
    %280 = arith.mulf %279, %271 : vector<4x256xf32>
    %281 = arith.addf %278, %280 : vector<4x256xf32>
    %c0_i32_125 = arith.constant 0 : i32
    %282 = vector.broadcast %c0_i32_125 : i32 to vector<1x256xi32>
    %283 = arith.cmpi eq, %1, %282 : vector<1x256xi32>
    %284 = vector.extract_strided_slice %276 {offsets = [0, 255], sizes = [4, 1], strides = [1, 1]} : vector<4x256xf32> to vector<4x1xf32>
    %285 = vector.extract_strided_slice %276 {offsets = [0, 0], sizes = [4, 255], strides = [1, 1]} : vector<4x256xf32> to vector<4x255xf32>
    %286 = tpu.concatenate %284, %285 in 1 : vector<4x1xf32>, vector<4x255xf32> -> vector<4x256xf32>
    %287 = vector.shape_cast %283 : vector<1x256xi1> to vector<1x256xi1>
    %288 = vector.broadcast %287 : vector<1x256xi1> to vector<4x256xi1>
    %289 = arith.select %288, %276, %286 : vector<4x256xi1>, vector<4x256xf32>
    %c15_i32_126 = arith.constant 15 : i32
    %290 = vector.broadcast %c15_i32_126 : i32 to vector<1x256xi32>
    %291 = arith.cmpi eq, %1, %290 : vector<1x256xi32>
    %292 = vector.extract_strided_slice %276 {offsets = [0, 1], sizes = [4, 255], strides = [1, 1]} : vector<4x256xf32> to vector<4x255xf32>
    %293 = vector.extract_strided_slice %276 {offsets = [0, 0], sizes = [4, 1], strides = [1, 1]} : vector<4x256xf32> to vector<4x1xf32>
    %294 = tpu.concatenate %292, %293 in 1 : vector<4x255xf32>, vector<4x1xf32> -> vector<4x256xf32>
    %295 = vector.shape_cast %291 : vector<1x256xi1> to vector<1x256xi1>
    %296 = vector.broadcast %295 : vector<1x256xi1> to vector<4x256xi1>
    %297 = arith.select %296, %276, %294 : vector<4x256xi1>, vector<4x256xf32>
    %cst_127 = arith.constant 2.500000e-01 : f32
    %298 = vector.broadcast %cst_127 : f32 to vector<4x256xf32>
    %299 = arith.mulf %298, %289 : vector<4x256xf32>
    %cst_128 = arith.constant 7.500000e-01 : f32
    %300 = vector.broadcast %cst_128 : f32 to vector<4x256xf32>
    %301 = arith.mulf %300, %276 : vector<4x256xf32>
    %302 = arith.addf %299, %301 : vector<4x256xf32>
    %cst_129 = arith.constant 7.500000e-01 : f32
    %303 = vector.broadcast %cst_129 : f32 to vector<4x256xf32>
    %304 = arith.mulf %303, %276 : vector<4x256xf32>
    %cst_130 = arith.constant 2.500000e-01 : f32
    %305 = vector.broadcast %cst_130 : f32 to vector<4x256xf32>
    %306 = arith.mulf %305, %297 : vector<4x256xf32>
    %307 = arith.addf %304, %306 : vector<4x256xf32>
    %c0_i32_131 = arith.constant 0 : i32
    %308 = vector.broadcast %c0_i32_131 : i32 to vector<1x256xi32>
    %309 = arith.cmpi eq, %1, %308 : vector<1x256xi32>
    %310 = vector.extract_strided_slice %281 {offsets = [0, 255], sizes = [4, 1], strides = [1, 1]} : vector<4x256xf32> to vector<4x1xf32>
    %311 = vector.extract_strided_slice %281 {offsets = [0, 0], sizes = [4, 255], strides = [1, 1]} : vector<4x256xf32> to vector<4x255xf32>
    %312 = tpu.concatenate %310, %311 in 1 : vector<4x1xf32>, vector<4x255xf32> -> vector<4x256xf32>
    %313 = vector.shape_cast %309 : vector<1x256xi1> to vector<1x256xi1>
    %314 = vector.broadcast %313 : vector<1x256xi1> to vector<4x256xi1>
    %315 = arith.select %314, %281, %312 : vector<4x256xi1>, vector<4x256xf32>
    %c15_i32_132 = arith.constant 15 : i32
    %316 = vector.broadcast %c15_i32_132 : i32 to vector<1x256xi32>
    %317 = arith.cmpi eq, %1, %316 : vector<1x256xi32>
    %318 = vector.extract_strided_slice %281 {offsets = [0, 1], sizes = [4, 255], strides = [1, 1]} : vector<4x256xf32> to vector<4x255xf32>
    %319 = vector.extract_strided_slice %281 {offsets = [0, 0], sizes = [4, 1], strides = [1, 1]} : vector<4x256xf32> to vector<4x1xf32>
    %320 = tpu.concatenate %318, %319 in 1 : vector<4x255xf32>, vector<4x1xf32> -> vector<4x256xf32>
    %321 = vector.shape_cast %317 : vector<1x256xi1> to vector<1x256xi1>
    %322 = vector.broadcast %321 : vector<1x256xi1> to vector<4x256xi1>
    %323 = arith.select %322, %281, %320 : vector<4x256xi1>, vector<4x256xf32>
    %cst_133 = arith.constant 2.500000e-01 : f32
    %324 = vector.broadcast %cst_133 : f32 to vector<4x256xf32>
    %325 = arith.mulf %324, %315 : vector<4x256xf32>
    %cst_134 = arith.constant 7.500000e-01 : f32
    %326 = vector.broadcast %cst_134 : f32 to vector<4x256xf32>
    %327 = arith.mulf %326, %281 : vector<4x256xf32>
    %328 = arith.addf %325, %327 : vector<4x256xf32>
    %cst_135 = arith.constant 7.500000e-01 : f32
    %329 = vector.broadcast %cst_135 : f32 to vector<4x256xf32>
    %330 = arith.mulf %329, %281 : vector<4x256xf32>
    %cst_136 = arith.constant 2.500000e-01 : f32
    %331 = vector.broadcast %cst_136 : f32 to vector<4x256xf32>
    %332 = arith.mulf %331, %323 : vector<4x256xf32>
    %333 = arith.addf %330, %332 : vector<4x256xf32>
    %334 = vector.extract_strided_slice %333 {offsets = [0, 239], sizes = [4, 17], strides = [1, 1]} : vector<4x256xf32> to vector<4x17xf32>
    %335 = vector.extract_strided_slice %333 {offsets = [0, 0], sizes = [4, 239], strides = [1, 1]} : vector<4x256xf32> to vector<4x239xf32>
    %336 = tpu.concatenate %334, %335 in 1 : vector<4x17xf32>, vector<4x239xf32> -> vector<4x256xf32>
    %c1_i32_137 = arith.constant 1 : i32
    %337 = vector.broadcast %c1_i32_137 : i32 to vector<1x256xi32>
    %338 = arith.cmpi slt, %0, %337 : vector<1x256xi32>
    %cst_138 = arith.constant 0.000000e+00 : f32
    %339 = vector.shape_cast %338 : vector<1x256xi1> to vector<1x256xi1>
    %340 = vector.broadcast %339 : vector<1x256xi1> to vector<4x256xi1>
    %341 = vector.broadcast %cst_138 : f32 to vector<4x256xf32>
    %342 = arith.select %340, %341, %336 : vector<4x256xi1>, vector<4x256xf32>
    %c1_i32_139 = arith.constant 1 : i32
    %343 = vector.broadcast %c1_i32_139 : i32 to vector<1x256xi32>
    %344 = arith.cmpi slt, %1, %343 : vector<1x256xi32>
    %cst_140 = arith.constant 0.000000e+00 : f32
    %345 = vector.shape_cast %344 : vector<1x256xi1> to vector<1x256xi1>
    %346 = vector.broadcast %345 : vector<1x256xi1> to vector<4x256xi1>
    %347 = vector.broadcast %cst_140 : f32 to vector<4x256xf32>
    %348 = arith.select %346, %347, %342 : vector<4x256xi1>, vector<4x256xf32>
    %c0_141 = arith.constant 0 : index
    %c1024 = arith.constant 1024 : index
    %349 = vector.load %arg5[%c0_141, %c1024] : memref<40x2048xf32, #tpu.memory_space<vmem>>, vector<4x256xf32>
    tpu.vector_store %arg5[%c0_141, %c1024], %348 {strides = array<i32>} : memref<40x2048xf32, #tpu.memory_space<vmem>>, vector<4x256xf32>,
    %350 = vector.extract_strided_slice %328 {offsets = [0, 240], sizes = [4, 16], strides = [1, 1]} : vector<4x256xf32> to vector<4x16xf32>
    %351 = vector.extract_strided_slice %328 {offsets = [0, 0], sizes = [4, 240], strides = [1, 1]} : vector<4x256xf32> to vector<4x240xf32>
    %352 = tpu.concatenate %350, %351 in 1 : vector<4x16xf32>, vector<4x240xf32> -> vector<4x256xf32>
    %c1_i32_142 = arith.constant 1 : i32
    %353 = vector.broadcast %c1_i32_142 : i32 to vector<1x256xi32>
    %354 = arith.cmpi slt, %0, %353 : vector<1x256xi32>
    %cst_143 = arith.constant 0.000000e+00 : f32
    %355 = vector.shape_cast %354 : vector<1x256xi1> to vector<1x256xi1>
    %356 = vector.broadcast %355 : vector<1x256xi1> to vector<4x256xi1>
    %357 = vector.broadcast %cst_143 : f32 to vector<4x256xf32>
    %358 = arith.select %356, %357, %352 : vector<4x256xi1>, vector<4x256xf32>
    %c4_144 = arith.constant 4 : index
    %c1024_145 = arith.constant 1024 : index
    %359 = vector.load %arg5[%c4_144, %c1024_145] : memref<40x2048xf32, #tpu.memory_space<vmem>>, vector<4x256xf32>
    tpu.vector_store %arg5[%c4_144, %c1024_145], %358 {strides = array<i32>} : memref<40x2048xf32, #tpu.memory_space<vmem>>, vector<4x256xf32>,
    %360 = vector.extract_strided_slice %333 {offsets = [0, 240], sizes = [4, 16], strides = [1, 1]} : vector<4x256xf32> to vector<4x16xf32>
    %361 = vector.extract_strided_slice %333 {offsets = [0, 0], sizes = [4, 240], strides = [1, 1]} : vector<4x256xf32> to vector<4x240xf32>
    %362 = tpu.concatenate %360, %361 in 1 : vector<4x16xf32>, vector<4x240xf32> -> vector<4x256xf32>
    %c1_i32_146 = arith.constant 1 : i32
    %363 = vector.broadcast %c1_i32_146 : i32 to vector<1x256xi32>
    %364 = arith.cmpi slt, %0, %363 : vector<1x256xi32>
    %cst_147 = arith.constant 0.000000e+00 : f32
    %365 = vector.shape_cast %364 : vector<1x256xi1> to vector<1x256xi1>
    %366 = vector.broadcast %365 : vector<1x256xi1> to vector<4x256xi1>
    %367 = vector.broadcast %cst_147 : f32 to vector<4x256xf32>
    %368 = arith.select %366, %367, %362 : vector<4x256xi1>, vector<4x256xf32>
    %c8_148 = arith.constant 8 : index
    %c1024_149 = arith.constant 1024 : index
    %369 = vector.load %arg5[%c8_148, %c1024_149] : memref<40x2048xf32, #tpu.memory_space<vmem>>, vector<4x256xf32>
    tpu.vector_store %arg5[%c8_148, %c1024_149], %368 {strides = array<i32>} : memref<40x2048xf32, #tpu.memory_space<vmem>>, vector<4x256xf32>,
    %370 = vector.extract_strided_slice %307 {offsets = [0, 255], sizes = [4, 1], strides = [1, 1]} : vector<4x256xf32> to vector<4x1xf32>
    %371 = vector.extract_strided_slice %307 {offsets = [0, 0], sizes = [4, 255], strides = [1, 1]} : vector<4x256xf32> to vector<4x255xf32>
    %372 = tpu.concatenate %370, %371 in 1 : vector<4x1xf32>, vector<4x255xf32> -> vector<4x256xf32>
    %c1_i32_150 = arith.constant 1 : i32
    %373 = vector.broadcast %c1_i32_150 : i32 to vector<1x256xi32>
    %374 = arith.cmpi slt, %1, %373 : vector<1x256xi32>
    %cst_151 = arith.constant 0.000000e+00 : f32
    %375 = vector.shape_cast %374 : vector<1x256xi1> to vector<1x256xi1>
    %376 = vector.broadcast %375 : vector<1x256xi1> to vector<4x256xi1>
    %377 = vector.broadcast %cst_151 : f32 to vector<4x256xf32>
    %378 = arith.select %376, %377, %372 : vector<4x256xi1>, vector<4x256xf32>
    %c12_152 = arith.constant 12 : index
    %c1024_153 = arith.constant 1024 : index
    %379 = vector.load %arg5[%c12_152, %c1024_153] : memref<40x2048xf32, #tpu.memory_space<vmem>>, vector<4x256xf32>
    tpu.vector_store %arg5[%c12_152, %c1024_153], %378 {strides = array<i32>} : memref<40x2048xf32, #tpu.memory_space<vmem>>, vector<4x256xf32>,
    %c16_154 = arith.constant 16 : index
    %c1024_155 = arith.constant 1024 : index
    %380 = vector.load %arg5[%c16_154, %c1024_155] : memref<40x2048xf32, #tpu.memory_space<vmem>>, vector<4x256xf32>
    tpu.vector_store %arg5[%c16_154, %c1024_155], %302 {strides = array<i32>} : memref<40x2048xf32, #tpu.memory_space<vmem>>, vector<4x256xf32>,
    %c20_156 = arith.constant 20 : index
    %c1024_157 = arith.constant 1024 : index
    %381 = vector.load %arg5[%c20_156, %c1024_157] : memref<40x2048xf32, #tpu.memory_space<vmem>>, vector<4x256xf32>
    tpu.vector_store %arg5[%c20_156, %c1024_157], %307 {strides = array<i32>} : memref<40x2048xf32, #tpu.memory_space<vmem>>, vector<4x256xf32>,
    %382 = vector.extract_strided_slice %333 {offsets = [0, 255], sizes = [4, 1], strides = [1, 1]} : vector<4x256xf32> to vector<4x1xf32>
    %383 = vector.extract_strided_slice %333 {offsets = [0, 0], sizes = [4, 255], strides = [1, 1]} : vector<4x256xf32> to vector<4x255xf32>
    %384 = tpu.concatenate %382, %383 in 1 : vector<4x1xf32>, vector<4x255xf32> -> vector<4x256xf32>
    %c1_i32_158 = arith.constant 1 : i32
    %385 = vector.broadcast %c1_i32_158 : i32 to vector<1x256xi32>
    %386 = arith.cmpi slt, %1, %385 : vector<1x256xi32>
    %cst_159 = arith.constant 0.000000e+00 : f32
    %387 = vector.shape_cast %386 : vector<1x256xi1> to vector<1x256xi1>
    %388 = vector.broadcast %387 : vector<1x256xi1> to vector<4x256xi1>
    %389 = vector.broadcast %cst_159 : f32 to vector<4x256xf32>
    %390 = arith.select %388, %389, %384 : vector<4x256xi1>, vector<4x256xf32>
    %c24_160 = arith.constant 24 : index
    %c1024_161 = arith.constant 1024 : index
    %391 = vector.load %arg5[%c24_160, %c1024_161] : memref<40x2048xf32, #tpu.memory_space<vmem>>, vector<4x256xf32>
    tpu.vector_store %arg5[%c24_160, %c1024_161], %390 {strides = array<i32>} : memref<40x2048xf32, #tpu.memory_space<vmem>>, vector<4x256xf32>,
    %c28_162 = arith.constant 28 : index
    %c1024_163 = arith.constant 1024 : index
    %392 = vector.load %arg5[%c28_162, %c1024_163] : memref<40x2048xf32, #tpu.memory_space<vmem>>, vector<4x256xf32>
    tpu.vector_store %arg5[%c28_162, %c1024_163], %328 {strides = array<i32>} : memref<40x2048xf32, #tpu.memory_space<vmem>>, vector<4x256xf32>,
    %c32_164 = arith.constant 32 : index
    %c1024_165 = arith.constant 1024 : index
    %393 = vector.load %arg5[%c32_164, %c1024_165] : memref<40x2048xf32, #tpu.memory_space<vmem>>, vector<4x256xf32>
    tpu.vector_store %arg5[%c32_164, %c1024_165], %333 {strides = array<i32>} : memref<40x2048xf32, #tpu.memory_space<vmem>>, vector<4x256xf32>,
    %c0_166 = arith.constant 0 : index
    %c1280 = arith.constant 1280 : index
    %394 = vector.load %arg5[%c0_166, %c1280] : memref<40x2048xf32, #tpu.memory_space<vmem>>, vector<4x256xf32>
    tpu.vector_store %arg5[%c0_166, %c1280], %358 {strides = array<i32>} : memref<40x2048xf32, #tpu.memory_space<vmem>>, vector<4x256xf32>,
    %c4_167 = arith.constant 4 : index
    %c1280_168 = arith.constant 1280 : index
    %395 = vector.load %arg5[%c4_167, %c1280_168] : memref<40x2048xf32, #tpu.memory_space<vmem>>, vector<4x256xf32>
    tpu.vector_store %arg5[%c4_167, %c1280_168], %368 {strides = array<i32>} : memref<40x2048xf32, #tpu.memory_space<vmem>>, vector<4x256xf32>,
    %396 = vector.extract_strided_slice %328 {offsets = [0, 241], sizes = [4, 15], strides = [1, 1]} : vector<4x256xf32> to vector<4x15xf32>
    %397 = vector.extract_strided_slice %328 {offsets = [0, 0], sizes = [4, 241], strides = [1, 1]} : vector<4x256xf32> to vector<4x241xf32>
    %398 = tpu.concatenate %396, %397 in 1 : vector<4x15xf32>, vector<4x241xf32> -> vector<4x256xf32>
    %c1_i32_169 = arith.constant 1 : i32
    %399 = vector.broadcast %c1_i32_169 : i32 to vector<1x256xi32>
    %400 = arith.cmpi slt, %0, %399 : vector<1x256xi32>
    %cst_170 = arith.constant 0.000000e+00 : f32
    %401 = vector.shape_cast %400 : vector<1x256xi1> to vector<1x256xi1>
    %402 = vector.broadcast %401 : vector<1x256xi1> to vector<4x256xi1>
    %403 = vector.broadcast %cst_170 : f32 to vector<4x256xf32>
    %404 = arith.select %402, %403, %398 : vector<4x256xi1>, vector<4x256xf32>
    %c15_i32_171 = arith.constant 15 : i32
    %405 = vector.broadcast %c15_i32_171 : i32 to vector<1x256xi32>
    %406 = arith.cmpi sge, %1, %405 : vector<1x256xi32>
    %cst_172 = arith.constant 0.000000e+00 : f32
    %407 = vector.shape_cast %406 : vector<1x256xi1> to vector<1x256xi1>
    %408 = vector.broadcast %407 : vector<1x256xi1> to vector<4x256xi1>
    %409 = vector.broadcast %cst_172 : f32 to vector<4x256xf32>
    %410 = arith.select %408, %409, %404 : vector<4x256xi1>, vector<4x256xf32>
    %c8_173 = arith.constant 8 : index
    %c1280_174 = arith.constant 1280 : index
    %411 = vector.load %arg5[%c8_173, %c1280_174] : memref<40x2048xf32, #tpu.memory_space<vmem>>, vector<4x256xf32>
    tpu.vector_store %arg5[%c8_173, %c1280_174], %410 {strides = array<i32>} : memref<40x2048xf32, #tpu.memory_space<vmem>>, vector<4x256xf32>,
    %c12_175 = arith.constant 12 : index
    %c1280_176 = arith.constant 1280 : index
    %412 = vector.load %arg5[%c12_175, %c1280_176] : memref<40x2048xf32, #tpu.memory_space<vmem>>, vector<4x256xf32>
    tpu.vector_store %arg5[%c12_175, %c1280_176], %302 {strides = array<i32>} : memref<40x2048xf32, #tpu.memory_space<vmem>>, vector<4x256xf32>,
    %c16_177 = arith.constant 16 : index
    %c1280_178 = arith.constant 1280 : index
    %413 = vector.load %arg5[%c16_177, %c1280_178] : memref<40x2048xf32, #tpu.memory_space<vmem>>, vector<4x256xf32>
    tpu.vector_store %arg5[%c16_177, %c1280_178], %307 {strides = array<i32>} : memref<40x2048xf32, #tpu.memory_space<vmem>>, vector<4x256xf32>,
    %414 = vector.extract_strided_slice %302 {offsets = [0, 1], sizes = [4, 255], strides = [1, 1]} : vector<4x256xf32> to vector<4x255xf32>
    %415 = vector.extract_strided_slice %302 {offsets = [0, 0], sizes = [4, 1], strides = [1, 1]} : vector<4x256xf32> to vector<4x1xf32>
    %416 = tpu.concatenate %414, %415 in 1 : vector<4x255xf32>, vector<4x1xf32> -> vector<4x256xf32>
    %c15_i32_179 = arith.constant 15 : i32
    %417 = vector.broadcast %c15_i32_179 : i32 to vector<1x256xi32>
    %418 = arith.cmpi sge, %1, %417 : vector<1x256xi32>
    %cst_180 = arith.constant 0.000000e+00 : f32
    %419 = vector.shape_cast %418 : vector<1x256xi1> to vector<1x256xi1>
    %420 = vector.broadcast %419 : vector<1x256xi1> to vector<4x256xi1>
    %421 = vector.broadcast %cst_180 : f32 to vector<4x256xf32>
    %422 = arith.select %420, %421, %416 : vector<4x256xi1>, vector<4x256xf32>
    %c20_181 = arith.constant 20 : index
    %c1280_182 = arith.constant 1280 : index
    %423 = vector.load %arg5[%c20_181, %c1280_182] : memref<40x2048xf32, #tpu.memory_space<vmem>>, vector<4x256xf32>
    tpu.vector_store %arg5[%c20_181, %c1280_182], %422 {strides = array<i32>} : memref<40x2048xf32, #tpu.memory_space<vmem>>, vector<4x256xf32>,
    %c24_183 = arith.constant 24 : index
    %c1280_184 = arith.constant 1280 : index
    %424 = vector.load %arg5[%c24_183, %c1280_184] : memref<40x2048xf32, #tpu.memory_space<vmem>>, vector<4x256xf32>
    tpu.vector_store %arg5[%c24_183, %c1280_184], %328 {strides = array<i32>} : memref<40x2048xf32, #tpu.memory_space<vmem>>, vector<4x256xf32>,
    %c28_185 = arith.constant 28 : index
    %c1280_186 = arith.constant 1280 : index
    %425 = vector.load %arg5[%c28_185, %c1280_186] : memref<40x2048xf32, #tpu.memory_space<vmem>>, vector<4x256xf32>
    tpu.vector_store %arg5[%c28_185, %c1280_186], %333 {strides = array<i32>} : memref<40x2048xf32, #tpu.memory_space<vmem>>, vector<4x256xf32>,
    %426 = vector.extract_strided_slice %328 {offsets = [0, 1], sizes = [4, 255], strides = [1, 1]} : vector<4x256xf32> to vector<4x255xf32>
    %427 = vector.extract_strided_slice %328 {offsets = [0, 0], sizes = [4, 1], strides = [1, 1]} : vector<4x256xf32> to vector<4x1xf32>
    %428 = tpu.concatenate %426, %427 in 1 : vector<4x255xf32>, vector<4x1xf32> -> vector<4x256xf32>
    %c15_i32_187 = arith.constant 15 : i32
    %429 = vector.broadcast %c15_i32_187 : i32 to vector<1x256xi32>
    %430 = arith.cmpi sge, %1, %429 : vector<1x256xi32>
    %cst_188 = arith.constant 0.000000e+00 : f32
    %431 = vector.shape_cast %430 : vector<1x256xi1> to vector<1x256xi1>
    %432 = vector.broadcast %431 : vector<1x256xi1> to vector<4x256xi1>
    %433 = vector.broadcast %cst_188 : f32 to vector<4x256xf32>
    %434 = arith.select %432, %433, %428 : vector<4x256xi1>, vector<4x256xf32>
    %c32_189 = arith.constant 32 : index
    %c1280_190 = arith.constant 1280 : index
    %435 = vector.load %arg5[%c32_189, %c1280_190] : memref<40x2048xf32, #tpu.memory_space<vmem>>, vector<4x256xf32>
    tpu.vector_store %arg5[%c32_189, %c1280_190], %434 {strides = array<i32>} : memref<40x2048xf32, #tpu.memory_space<vmem>>, vector<4x256xf32>,
    %c0_191 = arith.constant 0 : index
    %c1536 = arith.constant 1536 : index
    %436 = vector.load %arg5[%c0_191, %c1536] : memref<40x2048xf32, #tpu.memory_space<vmem>>, vector<4x256xf32>
    tpu.vector_store %arg5[%c0_191, %c1536], %378 {strides = array<i32>} : memref<40x2048xf32, #tpu.memory_space<vmem>>, vector<4x256xf32>,
    %c4_192 = arith.constant 4 : index
    %c1536_193 = arith.constant 1536 : index
    %437 = vector.load %arg5[%c4_192, %c1536_193] : memref<40x2048xf32, #tpu.memory_space<vmem>>, vector<4x256xf32>
    tpu.vector_store %arg5[%c4_192, %c1536_193], %302 {strides = array<i32>} : memref<40x2048xf32, #tpu.memory_space<vmem>>, vector<4x256xf32>,
    %c8_194 = arith.constant 8 : index
    %c1536_195 = arith.constant 1536 : index
    %438 = vector.load %arg5[%c8_194, %c1536_195] : memref<40x2048xf32, #tpu.memory_space<vmem>>, vector<4x256xf32>
    tpu.vector_store %arg5[%c8_194, %c1536_195], %307 {strides = array<i32>} : memref<40x2048xf32, #tpu.memory_space<vmem>>, vector<4x256xf32>,
    %c12_196 = arith.constant 12 : index
    %c1536_197 = arith.constant 1536 : index
    %439 = vector.load %arg5[%c12_196, %c1536_197] : memref<40x2048xf32, #tpu.memory_space<vmem>>, vector<4x256xf32>
    tpu.vector_store %arg5[%c12_196, %c1536_197], %390 {strides = array<i32>} : memref<40x2048xf32, #tpu.memory_space<vmem>>, vector<4x256xf32>,
    %c16_198 = arith.constant 16 : index
    %c1536_199 = arith.constant 1536 : index
    %440 = vector.load %arg5[%c16_198, %c1536_199] : memref<40x2048xf32, #tpu.memory_space<vmem>>, vector<4x256xf32>
    tpu.vector_store %arg5[%c16_198, %c1536_199], %328 {strides = array<i32>} : memref<40x2048xf32, #tpu.memory_space<vmem>>, vector<4x256xf32>,
    %c20_200 = arith.constant 20 : index
    %c1536_201 = arith.constant 1536 : index
    %441 = vector.load %arg5[%c20_200, %c1536_201] : memref<40x2048xf32, #tpu.memory_space<vmem>>, vector<4x256xf32>
    tpu.vector_store %arg5[%c20_200, %c1536_201], %333 {strides = array<i32>} : memref<40x2048xf32, #tpu.memory_space<vmem>>, vector<4x256xf32>,
    %442 = vector.extract_strided_slice %307 {offsets = [0, 15], sizes = [4, 241], strides = [1, 1]} : vector<4x256xf32> to vector<4x241xf32>
    %443 = vector.extract_strided_slice %307 {offsets = [0, 0], sizes = [4, 15], strides = [1, 1]} : vector<4x256xf32> to vector<4x15xf32>
    %444 = tpu.concatenate %442, %443 in 1 : vector<4x241xf32>, vector<4x15xf32> -> vector<4x256xf32>
    %c15_i32_202 = arith.constant 15 : i32
    %445 = vector.broadcast %c15_i32_202 : i32 to vector<1x256xi32>
    %446 = arith.cmpi sge, %0, %445 : vector<1x256xi32>
    %cst_203 = arith.constant 0.000000e+00 : f32
    %447 = vector.shape_cast %446 : vector<1x256xi1> to vector<1x256xi1>
    %448 = vector.broadcast %447 : vector<1x256xi1> to vector<4x256xi1>
    %449 = vector.broadcast %cst_203 : f32 to vector<4x256xf32>
    %450 = arith.select %448, %449, %444 : vector<4x256xi1>, vector<4x256xf32>
    %c1_i32_204 = arith.constant 1 : i32
    %451 = vector.broadcast %c1_i32_204 : i32 to vector<1x256xi32>
    %452 = arith.cmpi slt, %1, %451 : vector<1x256xi32>
    %cst_205 = arith.constant 0.000000e+00 : f32
    %453 = vector.shape_cast %452 : vector<1x256xi1> to vector<1x256xi1>
    %454 = vector.broadcast %453 : vector<1x256xi1> to vector<4x256xi1>
    %455 = vector.broadcast %cst_205 : f32 to vector<4x256xf32>
    %456 = arith.select %454, %455, %450 : vector<4x256xi1>, vector<4x256xf32>
    %c24_206 = arith.constant 24 : index
    %c1536_207 = arith.constant 1536 : index
    %457 = vector.load %arg5[%c24_206, %c1536_207] : memref<40x2048xf32, #tpu.memory_space<vmem>>, vector<4x256xf32>
    tpu.vector_store %arg5[%c24_206, %c1536_207], %456 {strides = array<i32>} : memref<40x2048xf32, #tpu.memory_space<vmem>>, vector<4x256xf32>,
    %458 = vector.extract_strided_slice %302 {offsets = [0, 16], sizes = [4, 240], strides = [1, 1]} : vector<4x256xf32> to vector<4x240xf32>
    %459 = vector.extract_strided_slice %302 {offsets = [0, 0], sizes = [4, 16], strides = [1, 1]} : vector<4x256xf32> to vector<4x16xf32>
    %460 = tpu.concatenate %458, %459 in 1 : vector<4x240xf32>, vector<4x16xf32> -> vector<4x256xf32>
    %c15_i32_208 = arith.constant 15 : i32
    %461 = vector.broadcast %c15_i32_208 : i32 to vector<1x256xi32>
    %462 = arith.cmpi sge, %0, %461 : vector<1x256xi32>
    %cst_209 = arith.constant 0.000000e+00 : f32
    %463 = vector.shape_cast %462 : vector<1x256xi1> to vector<1x256xi1>
    %464 = vector.broadcast %463 : vector<1x256xi1> to vector<4x256xi1>
    %465 = vector.broadcast %cst_209 : f32 to vector<4x256xf32>
    %466 = arith.select %464, %465, %460 : vector<4x256xi1>, vector<4x256xf32>
    %c28_210 = arith.constant 28 : index
    %c1536_211 = arith.constant 1536 : index
    %467 = vector.load %arg5[%c28_210, %c1536_211] : memref<40x2048xf32, #tpu.memory_space<vmem>>, vector<4x256xf32>
    tpu.vector_store %arg5[%c28_210, %c1536_211], %466 {strides = array<i32>} : memref<40x2048xf32, #tpu.memory_space<vmem>>, vector<4x256xf32>,
    %468 = vector.extract_strided_slice %307 {offsets = [0, 16], sizes = [4, 240], strides = [1, 1]} : vector<4x256xf32> to vector<4x240xf32>
    %469 = vector.extract_strided_slice %307 {offsets = [0, 0], sizes = [4, 16], strides = [1, 1]} : vector<4x256xf32> to vector<4x16xf32>
    %470 = tpu.concatenate %468, %469 in 1 : vector<4x240xf32>, vector<4x16xf32> -> vector<4x256xf32>
    %c15_i32_212 = arith.constant 15 : i32
    %471 = vector.broadcast %c15_i32_212 : i32 to vector<1x256xi32>
    %472 = arith.cmpi sge, %0, %471 : vector<1x256xi32>
    %cst_213 = arith.constant 0.000000e+00 : f32
    %473 = vector.shape_cast %472 : vector<1x256xi1> to vector<1x256xi1>
    %474 = vector.broadcast %473 : vector<1x256xi1> to vector<4x256xi1>
    %475 = vector.broadcast %cst_213 : f32 to vector<4x256xf32>
    %476 = arith.select %474, %475, %470 : vector<4x256xi1>, vector<4x256xf32>
    %c32_214 = arith.constant 32 : index
    %c1536_215 = arith.constant 1536 : index
    %477 = vector.load %arg5[%c32_214, %c1536_215] : memref<40x2048xf32, #tpu.memory_space<vmem>>, vector<4x256xf32>
    tpu.vector_store %arg5[%c32_214, %c1536_215], %476 {strides = array<i32>} : memref<40x2048xf32, #tpu.memory_space<vmem>>, vector<4x256xf32>,
    %c0_216 = arith.constant 0 : index
    %c1792 = arith.constant 1792 : index
    %478 = vector.load %arg5[%c0_216, %c1792] : memref<40x2048xf32, #tpu.memory_space<vmem>>, vector<4x256xf32>
    tpu.vector_store %arg5[%c0_216, %c1792], %302 {strides = array<i32>} : memref<40x2048xf32, #tpu.memory_space<vmem>>, vector<4x256xf32>,
    %c4_217 = arith.constant 4 : index
    %c1792_218 = arith.constant 1792 : index
    %479 = vector.load %arg5[%c4_217, %c1792_218] : memref<40x2048xf32, #tpu.memory_space<vmem>>, vector<4x256xf32>
    tpu.vector_store %arg5[%c4_217, %c1792_218], %307 {strides = array<i32>} : memref<40x2048xf32, #tpu.memory_space<vmem>>, vector<4x256xf32>,
    %c8_219 = arith.constant 8 : index
    %c1792_220 = arith.constant 1792 : index
    %480 = vector.load %arg5[%c8_219, %c1792_220] : memref<40x2048xf32, #tpu.memory_space<vmem>>, vector<4x256xf32>
    tpu.vector_store %arg5[%c8_219, %c1792_220], %422 {strides = array<i32>} : memref<40x2048xf32, #tpu.memory_space<vmem>>, vector<4x256xf32>,
    %c12_221 = arith.constant 12 : index
    %c1792_222 = arith.constant 1792 : index
    %481 = vector.load %arg5[%c12_221, %c1792_222] : memref<40x2048xf32, #tpu.memory_space<vmem>>, vector<4x256xf32>
    tpu.vector_store %arg5[%c12_221, %c1792_222], %328 {strides = array<i32>} : memref<40x2048xf32, #tpu.memory_space<vmem>>, vector<4x256xf32>,
    %c16_223 = arith.constant 16 : index
    %c1792_224 = arith.constant 1792 : index
    %482 = vector.load %arg5[%c16_223, %c1792_224] : memref<40x2048xf32, #tpu.memory_space<vmem>>, vector<4x256xf32>
    tpu.vector_store %arg5[%c16_223, %c1792_224], %333 {strides = array<i32>} : memref<40x2048xf32, #tpu.memory_space<vmem>>, vector<4x256xf32>,
    %c20_225 = arith.constant 20 : index
    %c1792_226 = arith.constant 1792 : index
    %483 = vector.load %arg5[%c20_225, %c1792_226] : memref<40x2048xf32, #tpu.memory_space<vmem>>, vector<4x256xf32>
    tpu.vector_store %arg5[%c20_225, %c1792_226], %434 {strides = array<i32>} : memref<40x2048xf32, #tpu.memory_space<vmem>>, vector<4x256xf32>,
    %c24_227 = arith.constant 24 : index
    %c1792_228 = arith.constant 1792 : index
    %484 = vector.load %arg5[%c24_227, %c1792_228] : memref<40x2048xf32, #tpu.memory_space<vmem>>, vector<4x256xf32>
    tpu.vector_store %arg5[%c24_227, %c1792_228], %466 {strides = array<i32>} : memref<40x2048xf32, #tpu.memory_space<vmem>>, vector<4x256xf32>,
    %c28_229 = arith.constant 28 : index
    %c1792_230 = arith.constant 1792 : index
    %485 = vector.load %arg5[%c28_229, %c1792_230] : memref<40x2048xf32, #tpu.memory_space<vmem>>, vector<4x256xf32>
    tpu.vector_store %arg5[%c28_229, %c1792_230], %476 {strides = array<i32>} : memref<40x2048xf32, #tpu.memory_space<vmem>>, vector<4x256xf32>,
    %486 = vector.extract_strided_slice %302 {offsets = [0, 17], sizes = [4, 239], strides = [1, 1]} : vector<4x256xf32> to vector<4x239xf32>
    %487 = vector.extract_strided_slice %302 {offsets = [0, 0], sizes = [4, 17], strides = [1, 1]} : vector<4x256xf32> to vector<4x17xf32>
    %488 = tpu.concatenate %486, %487 in 1 : vector<4x239xf32>, vector<4x17xf32> -> vector<4x256xf32>
    %c15_i32_231 = arith.constant 15 : i32
    %489 = vector.broadcast %c15_i32_231 : i32 to vector<1x256xi32>
    %490 = arith.cmpi sge, %0, %489 : vector<1x256xi32>
    %cst_232 = arith.constant 0.000000e+00 : f32
    %491 = vector.shape_cast %490 : vector<1x256xi1> to vector<1x256xi1>
    %492 = vector.broadcast %491 : vector<1x256xi1> to vector<4x256xi1>
    %493 = vector.broadcast %cst_232 : f32 to vector<4x256xf32>
    %494 = arith.select %492, %493, %488 : vector<4x256xi1>, vector<4x256xf32>
    %c15_i32_233 = arith.constant 15 : i32
    %495 = vector.broadcast %c15_i32_233 : i32 to vector<1x256xi32>
    %496 = arith.cmpi sge, %1, %495 : vector<1x256xi32>
    %cst_234 = arith.constant 0.000000e+00 : f32
    %497 = vector.shape_cast %496 : vector<1x256xi1> to vector<1x256xi1>
    %498 = vector.broadcast %497 : vector<1x256xi1> to vector<4x256xi1>
    %499 = vector.broadcast %cst_234 : f32 to vector<4x256xf32>
    %500 = arith.select %498, %499, %494 : vector<4x256xi1>, vector<4x256xf32>
    %c32_235 = arith.constant 32 : index
    %c1792_236 = arith.constant 1792 : index
    %501 = vector.load %arg5[%c32_235, %c1792_236] : memref<40x2048xf32, #tpu.memory_space<vmem>>, vector<4x256xf32>
    tpu.vector_store %arg5[%c32_235, %c1792_236], %500 {strides = array<i32>} : memref<40x2048xf32, #tpu.memory_space<vmem>>, vector<4x256xf32>,
    %c0_237 = arith.constant 0 : index
    %c0_238 = arith.constant 0 : index
    %502 = vector.load %arg2[%c0_237, %c0_238] : memref<8x40xf32, #tpu.memory_space<vmem>>, vector<8x40xf32>
    %c0_239 = arith.constant 0 : index
    %c0_240 = arith.constant 0 : index
    %503 = vector.load %arg5[%c0_239, %c0_240] : memref<40x2048xf32, #tpu.memory_space<vmem>>, vector<40x2048xf32>
    %cst_241 = arith.constant dense<0.000000e+00> : vector<8x2048xf32>
    %504 = tpu.matmul %502, %503, %cst_241 {dimension_numbers = #tpu.dot_dimension_numbers<[1], [0], [0], [1], [0, 0, 1, 1], [], []>} : vector<8x40xf32>, vector<40x2048xf32>, vector<8x2048xf32> -> vector<8x2048xf32>
    %c0_242 = arith.constant 0 : index
    %c0_243 = arith.constant 0 : index
    %505 = vector.load %arg4[%c0_242, %c0_243] : memref<8x2048xf32, #tpu.memory_space<vmem>>, vector<8x2048xf32>
    tpu.vector_store %arg4[%c0_242, %c0_243], %504 {strides = array<i32>} : memref<8x2048xf32, #tpu.memory_space<vmem>>, vector<8x2048xf32>,
    return
  }
  func.func @transform_0(%arg0: i32) -> (i32, i32, i32) {
    %c0_i32 = arith.constant 0 : i32
    %c0_i32_0 = arith.constant 0 : i32
    %c0_i32_1 = arith.constant 0 : i32
    return %arg0, %c0_i32, %c0_i32_0 : i32, i32, i32
  }
  func.func @transform_1(%arg0: i32) -> (i32, i32) {
    %c0_i32 = arith.constant 0 : i32
    %c0_i32_0 = arith.constant 0 : i32
    %c0_i32_1 = arith.constant 0 : i32
    return %c0_i32, %c0_i32_0 : i32, i32
  }
  func.func @transform_2(%arg0: i32) -> (i32, i32) {
    %c0_i32 = arith.constant 0 : i32
    %c0_i32_0 = arith.constant 0 : i32
    %c0_i32_1 = arith.constant 0 : i32
    return %c0_i32, %c0_i32_0 : i32, i32
  }
  func.func @transform_3(%arg0: i32) -> (i32, i32) {
    %c0_i32 = arith.constant 0 : i32
    %c0_i32_0 = arith.constant 0 : i32
    return %c0_i32, %arg0 : i32, i32
  }
}

</mosaic_0001>

<bundles_post_ra>
// kernel: upsample_conv2d_forward.1
= control target key start
LH: loop header
LB: loop body
LE: loop exit
PB: predicated region body
PF: predicated region fallthrough
CT: control target
= control target key end

     0   :  { %s1529_s14 = smov 112   ;;  %v1530_v14 = vmov 0   ;;  %vm79_vm1 = vcmask 916480   ;;  %vm117_vm4 = vcmask 1043456   ;;  %s1531_s17 = smov 127   ;;  %vm146_vm6 = vcmask 1039360   ;;  %s2339_s0 = inlined_call_operand.vmem [shape: f32[2,4,256], index: 0, kind: input, shape index: {}]   ;;  %s2340_s2 = inlined_call_operand.vmem [shape: s32[2,256], index: 2, kind: input, shape index: {}]   ;;  %s2341_s1 = inlined_call_operand.vmem [shape: f32[8,40], index: 1, kind: input, shape index: {}]   ;;  %s2342_s3 = inlined_call_operand.vmem [shape: f32[8,2048], index: 3, kind: output, shape index: {}]  }
   0x1   :  { %v39_v0 = vld [vmem:[%s2339_s0] sm:$0xff]  ;;  %s1532_s18 = smov 16   ;;  %vm2345_vm10 = vcmask 130048   ;;  %vm129_vm14 = vcmask 7168   ;;  %s1536_s22 = smov 15  }
   0x2   :  { %42 = vst [vmem:[#allocation1] ss:$2 sm:$0xff] %v39_v0  ;;  %v103_v9 = vmul.f32 0.75, %v39_v0  ;;  %v1575_v12 = vld [vmem:[%s2340_s2] ss:$2 sm:$0x3] }
   0x3   :  { %vm71_vm0 = vcmp.eq.s32.totalorder %v1575_v12, 15  ;;  %v1618_v44 = vld [vmem:[%s2340_s2 + $0x1] ss:$2 sm:$0x3]  ;;  %vm40_vm9 = vcmp.eq.s32.totalorder %v1575_v12, 0  ;;  %s1537_s23 = smov 111  }
   0x4   :  { %v89_v15 = vsel %vm71_vm0, 1, %v1530_v14  ;;  %vm141_vm5 = vcmp.eq.s32.totalorder %v1618_v44, 15  ;;  %vm121_vm13 = vcmp.eq.s32.totalorder %v1618_v44, 0  ;;  %s1538_s24 = smov 17   ;;  %s1539_s25 = smov 113  }
   0x5   :  { %v90_v16 = vperm.slane %v89_v15, 0  ;;  %v91_v17 = vperm.slane %v89_v15, 1  ;;  %v152_v46 = vsel %vm141_vm5, 1, %v1530_v14 }
   0x6   :  { %v153_v47 = vperm.slane %v152_v46, 0  ;;  %v154_v48 = vperm.slane %v152_v46, 1 }
   0x7   :  { %vm1579_vm2 = vcmp.eq.s32.totalorder %v90_v16, 1  ;;  %vm1584_vm3 = vcmp.eq.s32.totalorder %v91_v17, 1 }
   0x8   :  { %vm1622_vm7 = vcmp.eq.s32.totalorder %v153_v47, 1  ;;  %vm1626_vm8 = vcmp.eq.s32.totalorder %v154_v48, 1 }
   0x9   :  { %v43_v1 = vld.sshfl [vmem:[#allocation1 + $0x8] sm:$0xff pattern:$0x75316420] }
   0xa   :  { %47 = vst [vmem:[#allocation1] ss:$2 sm:$0xff] %v39_v0 }
  0x11   :  { %v48_v2 = vld.sshfl [vmem:[#allocation1] sm:$0xff pattern:$0x75316420]  ;;  %v1563_v3 = vld.sshfl [vmem:[#allocation1 + $0x8] sm:$0xff pattern:$0x75316420] }
  0x12   :  { %64 = vst [vmem:[#allocation1] ss:$2 sm:$0xff] %v39_v0 }
  0x19   :  { %v1565_v4 = vld.sshfl [vmem:[#allocation1] sm:$0xff pattern:$0x75316420]  ;;  %v1567_v5 = vld.sshfl [vmem:[#allocation1 + $0x8] sm:$0xff pattern:$0x75316420] }
  0x1a   :  { %72 = vst [vmem:[#allocation1] ss:$2 sm:$0xff] %v39_v0 }
  0x21   :  { %v74_v6 = vld.sshfl [vmem:[#allocation1 + $0x8] sm:$0xff pattern:$0x75316420]  ;;  %v73_v7 = vld.sshfl [vmem:[#allocation1] sm:$0xff pattern:$0x75316420] }
  0x22   :  { %77 = vrot.lane.b32.xlu0 %v74_v6, %s1529_s14  ;;  %75 = vrot.lane.b32.xlu1 %v73_v7, %s1529_s14  ;;  %83 = vst [vmem:[#allocation1] ss:$2 sm:$0xff] %v39_v0 }
  0x29   :  { %v84_v8 = vld.sshfl [vmem:[#allocation1] sm:$0xff pattern:$0x75316420] }
  0x2a   :  { %85 = vrot.lane.b32.xlu0 %v84_v8, %s1529_s14  ;;  %94 = vst [vmem:[#allocation1] ss:$2 sm:$0xff] %v39_v0 }
  0x31   :  { %v95_v10 = vld.sshfl [vmem:[#allocation1] sm:$0xff pattern:$0x75316420]  ;;  %v96_v11 = vld.sshfl [vmem:[#allocation1 + $0x8] sm:$0xff pattern:$0x75316420] }
  0x32   :  { %105 = vst [vmem:[#allocation1] ss:$2 sm:$0xff] %v103_v9  ;;  %44 = vrot.lane.b32.xlu0 %v43_v1, %s1532_s18  ;;  %v1533_v1 = vmov 1.0  }
  0x33   :  { %18 = vst [vmem:[#allocation2 + $0x204] ss:$8 sm:$0xf] %v1533_v1 }
  0x34   :  { %19 = vst [vmem:[#allocation2 + $0x204] ss:$8 sm:$0xf0] %v1533_v1 }
  0x35   :  { %21 = vst [vmem:[#allocation2 + $0x244] ss:$8 sm:$0xf] %v1533_v1 }
  0x36   :  { %22 = vst [vmem:[#allocation2 + $0x244] ss:$8 sm:$0xf0] %v1533_v1 }
  0x39   :  { %v1593_v29 = vld.sshfl [vmem:[#allocation1] sm:$0xff pattern:$0x75316420]  ;;  %v1595_v30 = vld.sshfl [vmem:[#allocation1 + $0x8] sm:$0xff pattern:$0x75316420] }
  0x94   :  { %v78_v13 = vpop.permute.xlu0 %77  ;;  %v76_v18 = vpop.permute.xlu1 %75 }
  0x95   :  { %v80_v20 = vsel %vm79_vm1, %v76_v18, %v78_v13 }
  0x96   :  { %v99_v24 = vsel %vm1579_vm2, %v95_v10, %v80_v20 }
  0x97   :  { %v112_v27 = vmul.f32 0.25, %v99_v24 }
  0x9c   :  { %v86_v22 = vpop.permute.xlu0 %85 }
  0x9d   :  { %v88_v23 = vsel %vm79_vm1, %v78_v13, %v86_v22 }
  0x9e   :  { %v100_v25 = vsel %vm1584_vm3, %v96_v11, %v88_v23 }
  0x9f   :  { %v113_v26 = vmul.f32 0.25, %v100_v25  ;;  %v1501_v25 = vld [vmem:[%s2339_s0 + $0x8] sm:$0xff]  ;;  %s1535_s0 = smov 1  }
  0xa1   :  { %v116_v28 = vrot.slane %v113_v26, 4 }
  0xa3   :  { %v118_v31 = vsel %vm117_vm4, %v112_v27, %v116_v28 }
  0xa4   :  { %v120_v32 = vadd.f32 %v118_v31, %v103_v9 }
  0xa6   :  { %170 = vst [vmem:[#allocation1] ss:$2 sm:$0xff] %v120_v32  ;;  %v218_v41 = vmul.f32 0.75, %v120_v32 }
  0xad   :  { %v1598_v33 = vld.sshfl [vmem:[#allocation1 + $0x8] sm:$0xff pattern:$0x75316420] }
  0xae   :  { %175 = vst [vmem:[#allocation1] ss:$2 sm:$0xff] %v120_v32 }
  0xb5   :  { %v1600_v34 = vld.sshfl [vmem:[#allocation1] sm:$0xff pattern:$0x75316420]  ;;  %v1602_v35 = vld.sshfl [vmem:[#allocation1 + $0x8] sm:$0xff pattern:$0x75316420] }
  0xb6   :  { %186 = vst [vmem:[#allocation1] ss:$2 sm:$0xff] %v120_v32 }
  0xbd   :  { %v1604_v36 = vld.sshfl [vmem:[#allocation1] sm:$0xff pattern:$0x75316420]  ;;  %v1606_v37 = vld.sshfl [vmem:[#allocation1 + $0x8] sm:$0xff pattern:$0x75316420] }
  0xbe   :  { %193 = vst [vmem:[#allocation1] ss:$2 sm:$0xff] %v120_v32 }
  0xc5   :  { %v194_v38 = vld.sshfl [vmem:[#allocation1] sm:$0xff pattern:$0x75316420]  ;;  %v195_v39 = vld.sshfl [vmem:[#allocation1 + $0x8] sm:$0xff pattern:$0x75316420] }
  0xc6   :  { %203 = vst [vmem:[#allocation1] ss:$2 sm:$0xff] %v120_v32  ;;  %198 = vrot.lane.b32.xlu1 %v195_v39, %s1531_s17 }
  0xcd   :  { %v204_v40 = vld.sshfl [vmem:[#allocation1] sm:$0xff pattern:$0x75316420] }
  0xce   :  { %209 = vst [vmem:[#allocation1] ss:$2 sm:$0xff] %v120_v32  ;;  %205 = vrot.lane.b32.xlu2 %v204_v40, %s1531_s17  ;;  %50 = vrot.lane.b32.xlu1 %v48_v2, %s1532_s18  ;;  %v1534_v2 = vmov 0.0   ;;  %v59_v40 = vsel %vm40_vm9, 1, %v1530_v14  ;;  %vm253_vm9 = vcmp.lt.s32.totalorder %v1575_v12, 1 }
  0xcf   :  { %23 = vst [vmem:[#allocation2 + $0x200] sm:$0xe0] %v1534_v2 }
  0xd0   :  { %24 = vst [vmem:[#allocation2 + $0x208] sm:$0xe0] %v1534_v2 }
  0xd1   :  { %25 = vst [vmem:[#allocation2 + $0x210] sm:$0xe0] %v1534_v2 }
  0xd2   :  { %26 = vst [vmem:[#allocation2 + $0x218] sm:$0xe0] %v1534_v2 }
  0xd3   :  { %27 = vst [vmem:[#allocation2 + $0x220] sm:$0xe0] %v1534_v2 }
  0xd4   :  { %28 = vst [vmem:[#allocation2 + $0x228] sm:$0xe0] %v1534_v2 }
  0xd5   :  { %v210_v42 = vld.sshfl [vmem:[#allocation1] sm:$0xff pattern:$0x75316420]  ;;  %v211_v43 = vld.sshfl [vmem:[#allocation1 + $0x8] sm:$0xff pattern:$0x75316420] }
  0xd6   :  { %196 = vrot.lane.b32.xlu2 %v194_v38, %s1531_s17  ;;  %220 = vst [vmem:[#allocation1] ss:$2 sm:$0xff] %v218_v41 }
  0xd7   :  { %29 = vst [vmem:[#allocation2 + $0x230] sm:$0xe0] %v1534_v2 }
  0xd8   :  { %30 = vst [vmem:[#allocation2 + $0x238] sm:$0xe0] %v1534_v2 }
  0xd9   :  { %31 = vst [vmem:[#allocation2 + $0x240] sm:$0xe0] %v1534_v2 }
  0xda   :  { %32 = vst [vmem:[#allocation2 + $0x248] sm:$0xe0] %v1534_v2 }
  0xdb   :  { %33 = vst [vmem:[#allocation2 + $0x250] sm:$0xe0] %v1534_v2 }
  0xdc   :  { %34 = vst [vmem:[#allocation2 + $0x258] sm:$0xe0] %v1534_v2 }
  0xdd   :  { %v1637_v62 = vld.sshfl [vmem:[#allocation1] sm:$0xff pattern:$0x75316420]  ;;  %v1639_v63 = vld.sshfl [vmem:[#allocation1 + $0x8] sm:$0xff pattern:$0x75316420] }
  0xde   :  { %52 = vrot.lane.b32.xlu2 %v1563_v3, %s1532_s18  ;;  %35 = vst [vmem:[#allocation2 + $0x260] sm:$0xe0] %v1534_v2 }
  0xdf   :  { %36 = vst [vmem:[#allocation2 + $0x268] sm:$0xe0] %v1534_v2 }
  0xe0   :  { %37 = vst [vmem:[#allocation2 + $0x270] sm:$0xe0] %v1534_v2 }
  0xe1   :  { %38 = vst [vmem:[#allocation2 + $0x278] sm:$0xe0] %v1534_v2 }
 0x128   :  { %v206_v45 = vpop.permute.xlu2 %205 }
 0x130   :  { %v197_v51 = vpop.permute.xlu2 %196 }
 0x138   :  { %v199_v52 = vpop.permute.xlu1 %198  ;;  %v53_v46 = vpop.permute.xlu2 %52 }
 0x139   :  { %v200_v53 = vsel %vm146_vm6, %v197_v51, %v199_v52  ;;  %v208_v54 = vsel %vm146_vm6, %v199_v52, %v206_v45  ;;  %v60_v52 = vperm.slane %v59_v40, 0 }
 0x13a   :  { %v214_v55 = vsel %vm1622_vm7, %v210_v42, %v200_v53  ;;  %v215_v56 = vsel %vm1626_vm8, %v211_v43, %v208_v54  ;;  %v45_v54 = vpop.permute.xlu0 %44 }
 0x13b   :  { %v228_v57 = vmul.f32 0.25, %v215_v56  ;;  %v227_v58 = vmul.f32 0.25, %v214_v55  ;;  %vm1684_vm12 = vcmp.eq.s32.totalorder %v60_v52, 1 }
 0x13d   :  { %v231_v59 = vrot.slane %v228_v57, 4 }
 0x13f   :  { %v232_v60 = vsel %vm117_vm4, %v227_v58, %v231_v59 }
 0x140   :  { %v234_v61 = vadd.f32 %v232_v60, %v218_v41  ;;  %v61_v41 = vperm.slane %v59_v40, 1  ;;  %v51_v45 = vpop.permute.xlu1 %50 }
 0x141   :  { %v55_v48 = vsel %vm2345_vm10, %v51_v45, %v53_v46  ;;  %v58_v57 = vsel %vm2345_vm10, %v45_v54, %v51_v45 }
 0x142   :  { %236 = vst [vmem:[#allocation1] ss:$2 sm:$0xff] %v234_v61  ;;  %vm1672_vm11 = vcmp.eq.s32.totalorder %v61_v41, 1 }
 0x143   :  { %v70_v51 = vsel %vm1672_vm11, %v1567_v5, %v55_v48  ;;  %v636_v5 = vmul.f32 0.75, %v1501_v25 }
 0x144   :  { %v102_v55 = vmul.f32 0.25, %v70_v51 }
 0x146   :  { %v1690_v58 = vadd.f32 %v1595_v30, %v102_v55 }
 0x149   :  { %v1641_v0 = vld.sshfl [vmem:[#allocation1 + $0x8] sm:$0xff pattern:$0x75316420] }
 0x14a   :  { %241 = vst [vmem:[#allocation1] ss:$2 sm:$0xff] %v234_v61 }
 0x151   :  { %v1643_v3 = vld.sshfl [vmem:[#allocation1] sm:$0xff pattern:$0x75316420]  ;;  %v1645_v6 = vld.sshfl [vmem:[#allocation1 + $0x8] sm:$0xff pattern:$0x75316420] }
 0x152   :  { %292 = vst [vmem:[#allocation1] ss:$2 sm:$0xff] %v234_v61 }
 0x159   :  { %v1647_v7 = vld.sshfl [vmem:[#allocation1 + $0x8] sm:$0xff pattern:$0x75316420] }
 0x15a   :  { %297 = vst [vmem:[#allocation1] ss:$2 sm:$0xff] %v234_v61 }
 0x161   :  { %v1649_v8 = vld.sshfl [vmem:[#allocation1] sm:$0xff pattern:$0x75316420]  ;;  %v1651_v9 = vld.sshfl [vmem:[#allocation1 + $0x8] sm:$0xff pattern:$0x75316420] }
 0x162   :  { %341 = vst [vmem:[#allocation1] ss:$2 sm:$0xff] %v234_v61 }
 0x169   :  { %v1653_v10 = vld.sshfl [vmem:[#allocation1 + $0x8] sm:$0xff pattern:$0x75316420] }
 0x16a   :  { %346 = vst [vmem:[#allocation1] ss:$2 sm:$0xff] %v234_v61 }
 0x171   :  { %v1655_v11 = vld.sshfl [vmem:[#allocation1] sm:$0xff pattern:$0x75316420]  ;;  %v1657_v13 = vld.sshfl [vmem:[#allocation1 + $0x8] sm:$0xff pattern:$0x75316420] }
 0x172   :  { %367 = vst [vmem:[#allocation1] ss:$2 sm:$0xff] %v234_v61 }
 0x179   :  { %v368_v15 = vld.sshfl [vmem:[#allocation1] sm:$0xff pattern:$0x75316420]  ;;  %v369_v16 = vld.sshfl [vmem:[#allocation1 + $0x8] sm:$0xff pattern:$0x75316420] }
 0x17a   :  { %372 = vst [vmem:[#allocation2 + $0x200] sm:$0xf] %v368_v15 }
 0x17b   :  { %438 = vst [vmem:[#allocation1 + $0x1] ss:$2 sm:$0xff] %v234_v61 }
 0x17c   :  { %373 = vst [vmem:[#allocation2 + $0x208] sm:$0xf] %v369_v16 }
 0x181   :  { %v1140_v17 = vld [vmem:[#allocation2 + $0x200] sm:$0xff] }
 0x182   :  { %v439_v18 = vld.sshfl [vmem:[#allocation1] sm:$0xff pattern:$0x75316420]  ;;  %v440_v20 = vld.sshfl [vmem:[#allocation1 + $0x8] sm:$0xff pattern:$0x75316420]  ;;  %1171 = vmatpush.msra.mxu0 %v1140_v17 }
 0x183   :  { %475 = vst [vmem:[#allocation1 + $0x1] ss:$2 sm:$0xff] %v234_v61  ;;  %v1141_v22 = vld [vmem:[#allocation2 + $0x208] sm:$0xff]  ;;  %v134_v17 = vsel %vm121_vm13, 1, %v1530_v14 }
 0x184   :  { %443 = vst [vmem:[#allocation2 + $0x190] sm:$0xf0] %v439_v18  ;;  %1191 = vmatpush.msra.mxu1 %v1141_v22 }
 0x185   :  { %444 = vst [vmem:[#allocation2 + $0x198] sm:$0xf0] %v440_v20 }
 0x18a   :  { %v476_v23 = vld.sshfl [vmem:[#allocation1] sm:$0xff pattern:$0x75316420]  ;;  %v477_v24 = vld.sshfl [vmem:[#allocation1 + $0x8] sm:$0xff pattern:$0x75316420] }
 0x18b   :  { %480 = vst [vmem:[#allocation2 + $0x120] sm:$0xf0] %v476_v23 }
 0x18c   :  { %481 = vst [vmem:[#allocation2 + $0x128] sm:$0xf0] %v477_v24  ;;  %v135_v24 = vperm.slane %v134_v17, 0 }
 0x18d   :  { %544 = vst [vmem:[#allocation1] ss:$2 sm:$0xff] %v234_v61 }
 0x18e   :  { %vm1725_vm15 = vcmp.eq.s32.totalorder %v135_v24, 1 }
 0x194   :  { %v545_v26 = vld.sshfl [vmem:[#allocation1] sm:$0xff pattern:$0x75316420]  ;;  %v546_v27 = vld.sshfl [vmem:[#allocation1 + $0x8] sm:$0xff pattern:$0x75316420] }
 0x195   :  { %588 = vst [vmem:[#allocation1] ss:$2 sm:$0xff] %v1501_v25 }
 0x196   :  { %549 = vst [vmem:[#allocation2 + $0x130] sm:$0xf] %v545_v26 }
 0x197   :  { %550 = vst [vmem:[#allocation2 + $0x138] sm:$0xf] %v546_v27 }
 0x19c   :  { %v589_v28 = vld.sshfl [vmem:[#allocation1 + $0x8] sm:$0xff pattern:$0x75316420] }
 0x19d   :  { %590 = vrot.lane.b32.xlu0 %v589_v28, %s1532_s18  ;;  %593 = vst [vmem:[#allocation1] ss:$2 sm:$0xff] %v1501_v25 }
 0x1a4   :  { %v594_v31 = vld.sshfl [vmem:[#allocation1] sm:$0xff pattern:$0x75316420]  ;;  %v595_v32 = vld.sshfl [vmem:[#allocation1 + $0x8] sm:$0xff pattern:$0x75316420] }
 0x1a5   :  { %596 = vrot.lane.b32.xlu1 %v594_v31, %s1532_s18  ;;  %604 = vst [vmem:[#allocation1] ss:$2 sm:$0xff] %v1501_v25 }
 0x1ac   :  { %v1664_v38 = vld.sshfl [vmem:[#allocation1] sm:$0xff pattern:$0x75316420]  ;;  %v1666_v39 = vld.sshfl [vmem:[#allocation1 + $0x8] sm:$0xff pattern:$0x75316420] }
 0x1ad   :  { %611 = vst [vmem:[#allocation1] ss:$2 sm:$0xff] %v1501_v25 }
 0x1b4   :  { %v613_v42 = vld.sshfl [vmem:[#allocation1 + $0x8] sm:$0xff pattern:$0x75316420]  ;;  %v612_v43 = vld.sshfl [vmem:[#allocation1] sm:$0xff pattern:$0x75316420] }
 0x1b5   :  { %616 = vrot.lane.b32.xlu0 %v613_v42, %s1529_s14  ;;  %614 = vrot.lane.b32.xlu2 %v612_v43, %s1529_s14  ;;  %621 = vst [vmem:[#allocation1] ss:$2 sm:$0xff] %v1501_v25 }
 0x1bc   :  { %v622_v53 = vld.sshfl [vmem:[#allocation1] sm:$0xff pattern:$0x75316420] }
 0x1bd   :  { %172 = vrot.lane.b32.xlu0 %v1598_v33, %s1535_s0  ;;  %598 = vrot.lane.b32.xlu2 %v595_v32, %s1532_s18  ;;  %627 = vst [vmem:[#allocation1] ss:$2 sm:$0xff] %v1501_v25  ;;  %v69_v33 = vsel %vm1684_vm12, %v1565_v4, %v58_v57  ;;  %v136_v25 = vperm.slane %v134_v17, 1 }
 0x1be   :  { %623 = vrot.lane.b32.xlu1 %v622_v53, %s1529_s14  ;;  %v101_v61 = vmul.f32 0.25, %v69_v33 }
 0x1bf   :  { %vm1729_vm0 = vcmp.eq.s32.totalorder %v136_v25, 1 }
 0x1c0   :  { %v1702_v30 = vadd.f32 %v1593_v29, %v101_v61 }
 0x1c4   :  { %v628_v59 = vld.sshfl [vmem:[#allocation1] sm:$0xff pattern:$0x75316420]  ;;  %v629_v60 = vld.sshfl [vmem:[#allocation1 + $0x8] sm:$0xff pattern:$0x75316420] }
 0x1c5   :  { %123 = vrot.lane.b32.xlu0 %v1690_v58, %s1535_s0  ;;  %180 = vrot.lane.b32.xlu2 %v1602_v35, %s1535_s0  ;;  %638 = vst [vmem:[#allocation1] ss:$2 sm:$0xff] %v636_v5 }
 0x1c6   :  { %178 = vrot.lane.b32.xlu1 %v1600_v34, %s1535_s0 }
 0x1cc   :  { %v1735_v42 = vld.sshfl [vmem:[#allocation1] sm:$0xff pattern:$0x75316420]  ;;  %v1737_v43 = vld.sshfl [vmem:[#allocation1 + $0x8] sm:$0xff pattern:$0x75316420] }
 0x1cd   :  { %144 = vrot.lane.b32.xlu0 %v1690_v58, %s1531_s17  ;;  %142 = vrot.lane.b32.xlu2 %v1702_v30, %s1531_s17 }
 0x1ce   :  { %127 = vrot.lane.b32.xlu1 %v1702_v30, %s1535_s0 }
 0x20f   :  { %v1710_v4 = vpop.permute.xlu0 %590  ;;  %v615_v35 = vpop.permute.xlu2 %614 }
 0x217   :  { %v1712_v2 = vpop.permute.xlu1 %596  ;;  %v1714_v15 = vpop.permute.xlu2 %598 }
 0x21f   :  { %v181_v26 = vpop.permute.xlu2 %180 }
 0x227   :  { %v617_v1 = vpop.permute.xlu0 %616  ;;  %v143_v57 = vpop.permute.xlu2 %142 }
 0x228   :  { %v618_v29 = vsel %vm79_vm1, %v615_v35, %v617_v1 }
 0x229   :  { %v632_v20 = vsel %vm1579_vm2, %v628_v59, %v618_v29  ;;  %vm396_vm2 = vcmp.ge.s32.totalorder %v1618_v44, 15 }
 0x22a   :  { %v645_v27 = vmul.f32 0.25, %v632_v20 }
 0x22f   :  { %v173_v34 = vpop.permute.xlu0 %172 }
 0x230   :  { %v624_v16 = vpop.permute.xlu1 %623 }
 0x231   :  { %v626_v18 = vsel %vm79_vm1, %v617_v1, %v624_v16 }
 0x232   :  { %v633_v22 = vsel %vm1584_vm3, %v629_v60, %v626_v18 }
 0x233   :  { %v646_v23 = vmul.f32 0.25, %v633_v22 }
 0x235   :  { %v649_v28 = vrot.slane %v646_v23, 4 }
 0x237   :  { %v650_v31 = vsel %vm117_vm4, %v645_v27, %v649_v28  ;;  %v124_v32 = vpop.permute.xlu0 %123 }
 0x238   :  { %v1733_v21 = vadd.f32 %v650_v31, %v636_v5  ;;  %v179_v41 = vpop.permute.xlu1 %178 }
 0x239   :  { %v182_v45 = vsel %vm129_vm14, %v179_v41, %v181_v26  ;;  %v185_v46 = vsel %vm129_vm14, %v173_v34, %v179_v41 }
 0x23a   :  { %688 = vst [vmem:[#allocation1] ss:$2 sm:$0xff] %v1733_v21  ;;  %v191_v48 = vsel %vm1725_vm15, %v1604_v36, %v185_v46  ;;  %v192_v51 = vsel %vm1729_vm0, %v1606_v37, %v182_v45  ;;  %v161_v37 = vmul.f32 0.75, %v1702_v30 }
 0x23b   :  { %v216_v52 = vmul.f32 0.25, %v191_v48  ;;  %v217_v53 = vmul.f32 0.25, %v192_v51 }
 0x23d   :  { %v1749_v54 = vadd.f32 %v1637_v62, %v216_v52  ;;  %v1752_v55 = vadd.f32 %v1639_v63, %v217_v53  ;;  %v162_v62 = vmul.f32 0.75, %v1690_v58 }
 0x23f   :  { %v361_v5 = vrot.slane %v1749_v54, 4  ;;  %v362_v33 = vrot.slane %v1752_v55, 4  ;;  %435 = vst [vmem:[#allocation2 + $0x190] sm:$0xf] %v1749_v54  ;;  %445 = vrot.lane.b32.xlu2 %v1749_v54, %s1531_s17  ;;  %447 = vrot.lane.b32.xlu0 %v1752_v55, %s1531_s17  ;;  %v145_v36 = vpop.permute.xlu0 %144 }
 0x240   :  { %436 = vst [vmem:[#allocation2 + $0x198] sm:$0xf] %v1752_v55  ;;  %v147_v63 = vsel %vm146_vm6, %v143_v57, %v145_v36  ;;  %v151_v59 = vsel %vm146_vm6, %v145_v36, %v143_v57  ;;  %v128_v60 = vpop.permute.xlu1 %127 }
 0x241   :  { %365 = vst [vmem:[#allocation2 + $0x180] sm:$0xf0] %v361_v5  ;;  %v157_v61 = vsel %vm1622_vm7, %v1702_v30, %v147_v63  ;;  %v158_v35 = vsel %vm1626_vm8, %v1690_v58, %v151_v59  ;;  %v130_v1 = vsel %vm129_vm14, %v128_v60, %v124_v32  ;;  %v133_v29 = vsel %vm129_vm14, %v124_v32, %v128_v60  ;;  %v689_v31 = vld.sshfl [vmem:[#allocation1 + $0x8] sm:$0xff pattern:$0x75316420] }
 0x242   :  { %366 = vst [vmem:[#allocation2 + $0x188] sm:$0xf0] %v362_v33  ;;  %v165_v34 = vmul.f32 0.25, %v157_v61  ;;  %v166_v16 = vmul.f32 0.25, %v158_v35  ;;  %v139_v17 = vsel %vm1725_vm15, %v1702_v30, %v133_v29  ;;  %v140_v18 = vsel %vm1729_vm0, %v1690_v58, %v130_v1 }
 0x243   :  { %472 = vst [vmem:[#allocation2 + $0x120] sm:$0xf] %v1749_v54  ;;  %v159_v20 = vmul.f32 0.25, %v139_v17  ;;  %v160_v22 = vmul.f32 0.25, %v140_v18 }
 0x244   :  { %473 = vst [vmem:[#allocation2 + $0x128] sm:$0xf] %v1752_v55  ;;  %v1782_v23 = vadd.f32 %v165_v34, %v161_v37  ;;  %v1784_v24 = vadd.f32 %v166_v16, %v162_v62 }
 0x245   :  { %542 = vst [vmem:[#allocation2 + $0xb0] sm:$0xf0] %v361_v5  ;;  %v1786_v25 = vadd.f32 %v161_v37, %v159_v20  ;;  %v1788_v26 = vadd.f32 %v162_v62, %v160_v22  ;;  %v254_v62 = vsel %vm253_vm9, 1, %v1530_v14  ;;  %vm2344_vm9 = vcmask 908288  }
 0x246   :  { %543 = vst [vmem:[#allocation2 + $0xb8] sm:$0xf0] %v362_v33  ;;  %v335_v30 = vrot.slane %v1782_v23, 4  ;;  %v336_v58 = vrot.slane %v1784_v24, 4  ;;  %v255_v1 = vperm.slane %v254_v62, 0  ;;  %v256_v17 = vperm.slane %v254_v62, 1 }
 0x247   :  { %414 = vst [vmem:[#allocation2 + $0x110] sm:$0xf] %v1782_v23  ;;  %384 = vrot.lane.b32.xlu0 %v1752_v55, %s1536_s22  ;;  %416 = vrot.lane.b32.xlu1 %v1786_v25, %s1531_s17  ;;  %v408_v27 = vrot.slane %v1786_v25, 4  ;;  %v409_v28 = vrot.slane %v1788_v26, 4 }
 0x248   :  { %339 = vst [vmem:[#allocation2 + $0x100] sm:$0xf0] %v335_v30  ;;  %418 = vrot.lane.b32.xlu2 %v1788_v26, %s1531_s17  ;;  %vm1931_vm13 = vcmp.eq.s32.totalorder %v255_v1, 1 }
 0x249   :  { %340 = vst [vmem:[#allocation2 + $0x108] sm:$0xf0] %v336_v58 }
 0x24a   :  { %415 = vst [vmem:[#allocation2 + $0x118] sm:$0xf] %v1784_v24 }
 0x24b   :  { %462 = vst [vmem:[#allocation2 + $0xa0] sm:$0xf] %v1782_v23 }
 0x24c   :  { %463 = vst [vmem:[#allocation2 + $0xa8] sm:$0xf] %v1784_v24 }
 0x24d   :  { %538 = vst [vmem:[#allocation2 + $0x30] sm:$0xf0] %v335_v30 }
 0x24e   :  { %539 = vst [vmem:[#allocation2 + $0x38] sm:$0xf0] %v336_v58 }
 0x24f   :  { %333 = vst [vmem:[#allocation2 + $0x100] sm:$0xf] %v1786_v25  ;;  %300 = vrot.lane.b32.xlu0 %v1649_v8, %s1532_s18  ;;  %387 = vrot.lane.b32.xlu1 %v1749_v54, %s1536_s22 }
 0x250   :  { %334 = vst [vmem:[#allocation2 + $0x108] sm:$0xf] %v1788_v26  ;;  %294 = vrot.lane.b32.xlu2 %v1647_v7, %s1532_s18  ;;  %v603_v7 = vsel %vm2345_vm10, %v1710_v4, %v1712_v2  ;;  %v600_v4 = vsel %vm2345_vm10, %v1712_v2, %v1714_v15 }
 0x251   :  { %412 = vst [vmem:[#allocation2 + $0x90] sm:$0xf0] %v408_v27  ;;  %v609_v8 = vsel %vm1684_vm12, %v1664_v38, %v603_v7  ;;  %v610_v56 = vsel %vm1672_vm11, %v1666_v39, %v600_v4  ;;  %vm492_vm11 = vcmp.ge.s32.totalorder %v1575_v12, 15  ;;  %vm2343_vm12 = vcmask 121856  }
 0x252   :  { %413 = vst [vmem:[#allocation2 + $0x98] sm:$0xf0] %v409_v28  ;;  %v635_v2 = vmul.f32 0.25, %v610_v56 }
 0x253   :  { %460 = vst [vmem:[#allocation2 + $0x20] sm:$0xf0] %v408_v27 }
 0x254   :  { %461 = vst [vmem:[#allocation2 + $0x28] sm:$0xf0] %v409_v28  ;;  %v1855_v15 = vadd.f32 %v1737_v43, %v635_v2 }
 0x255   :  { %536 = vst [vmem:[#allocation2 + $0x30] sm:$0xf] %v1786_v25 }
 0x256   :  { %537 = vst [vmem:[#allocation2 + $0x38] sm:$0xf] %v1788_v26 }
 0x257   :  { %302 = vrot.lane.b32.xlu1 %v1651_v9, %s1532_s18  ;;  %571 = vrot.lane.b32.xlu0 %v1788_v26, %s1537_s23  ;;  %693 = vst [vmem:[#allocation1] ss:$2 sm:$0xff] %v1733_v21  ;;  %v634_v9 = vmul.f32 0.25, %v609_v8 }
 0x258   :  { %569 = vrot.lane.b32.xlu2 %v1786_v25, %s1537_s23 }
 0x259   :  { %v1838_v38 = vadd.f32 %v1735_v42, %v634_v9  ;;  %v1868_v42 = vmul.f32 0.75, %v1733_v21 }
 0x25e   :  { %v695_v32 = vld.sshfl [vmem:[#allocation1 + $0x8] sm:$0xff pattern:$0x75316420]  ;;  %v694_v41 = vld.sshfl [vmem:[#allocation1] sm:$0xff pattern:$0x75316420] }
 0x25f   :  { %272 = vrot.lane.b32.xlu1 %v1752_v55, %s1532_s18  ;;  %343 = vrot.lane.b32.xlu0 %v1653_v10, %s1535_s0  ;;  %704 = vst [vmem:[#allocation1] ss:$2 sm:$0xff] %v1733_v21 }
 0x260   :  { %276 = vrot.lane.b32.xlu2 %v1749_v54, %s1532_s18 }
 0x266   :  { %v1843_v45 = vld.sshfl [vmem:[#allocation1] sm:$0xff pattern:$0x75316420]  ;;  %v1845_v10 = vld.sshfl [vmem:[#allocation1 + $0x8] sm:$0xff pattern:$0x75316420] }
 0x267   :  { %349 = vrot.lane.b32.xlu1 %v1655_v11, %s1535_s0  ;;  %666 = vrot.lane.b32.xlu0 %v1838_v38, %s1531_s17  ;;  %711 = vst [vmem:[#allocation1] ss:$2 sm:$0xff] %v1733_v21 }
 0x268   :  { %658 = vrot.lane.b32.xlu2 %v1838_v38, %s1535_s0 }
 0x26e   :  { %v713_v39 = vld.sshfl [vmem:[#allocation1 + $0x8] sm:$0xff pattern:$0x75316420]  ;;  %v712_v47 = vld.sshfl [vmem:[#allocation1] sm:$0xff pattern:$0x75316420] }
 0x26f   :  { %654 = vrot.lane.b32.xlu1 %v1855_v15, %s1535_s0  ;;  %698 = vrot.lane.b32.xlu0 %v695_v32, %s1535_s0  ;;  %721 = vst [vmem:[#allocation1] ss:$2 sm:$0xff] %v1733_v21 }
 0x270   :  { %696 = vrot.lane.b32.xlu2 %v694_v41, %s1535_s0 }
 0x276   :  { %v722_v11 = vld.sshfl [vmem:[#allocation1] sm:$0xff pattern:$0x75316420] }
 0x277   :  { %668 = vrot.lane.b32.xlu1 %v1855_v15, %s1531_s17  ;;  %716 = vrot.lane.b32.xlu0 %v713_v39, %s1531_s17  ;;  %727 = vst [vmem:[#allocation1] ss:$2 sm:$0xff] %v1733_v21 }
 0x278   :  { %714 = vrot.lane.b32.xlu2 %v712_v47, %s1531_s17 }
 0x27e   :  { %v1870_v43 = vld.sshfl [vmem:[#allocation1] sm:$0xff pattern:$0x75316420]  ;;  %v1872_v46 = vld.sshfl [vmem:[#allocation1 + $0x8] sm:$0xff pattern:$0x75316420] }
 0x27f   :  { %690 = vrot.lane.b32.xlu1 %v689_v31, %s1535_s0  ;;  %523 = vrot.lane.b32.xlu0 %v1782_v23, %s1529_s14  ;;  %738 = vst [vmem:[#allocation1] ss:$2 sm:$0xff] %v1868_v42 }
 0x280   :  { %351 = vrot.lane.b32.xlu2 %v1657_v13, %s1535_s0 }
 0x287   :  { %723 = vrot.lane.b32.xlu1 %v722_v11, %s1531_s17  ;;  %317 = vrot.lane.b32.xlu0 %v1782_v23, %s1535_s0 }
 0x288   :  { %313 = vrot.lane.b32.xlu2 %v1784_v24, %s1535_s0 }
 0x28f   :  { %525 = vrot.lane.b32.xlu1 %v1784_v24, %s1529_s14  ;;  %238 = vrot.lane.b32.xlu0 %v1641_v0, %s1538_s24  ;;  %v397_v0 = vsel %vm396_vm2, 1, %v1530_v14  ;;  %vm1935_vm2 = vcmp.eq.s32.totalorder %v256_v17, 1 }
 0x290   :  { %506 = vrot.lane.b32.xlu2 %v1788_v26, %s1529_s14  ;;  %v398_v51 = vperm.slane %v397_v0, 0  ;;  %v399_v52 = vperm.slane %v397_v0, 1 }
 0x292   :  { %vm1903_vm3 = vcmp.eq.s32.totalorder %v398_v51, 1  ;;  %vm1907_vm5 = vcmp.eq.s32.totalorder %v399_v52, 1 }
 0x297   :  { %504 = vrot.lane.b32.xlu1 %v1786_v25, %s1529_s14  ;;  %482 = vrot.lane.b32.xlu0 %v1782_v23, %s1539_s25  ;;  %v1126_v23 = vld [vmem:[#allocation2 + $0x190] sm:$0xff]  ;;  %v493_v25 = vsel %vm492_vm11, 1, %v1530_v14 }
 0x298   :  { %246 = vrot.lane.b32.xlu2 %v1645_v6, %s1538_s24  ;;  %v494_v8 = vperm.slane %v493_v25, 0  ;;  %v495_v4 = vperm.slane %v493_v25, 1 }
 0x299   :  { %v446_v13 = vpop.permute.xlu2 %445 }
 0x29a   :  { %vm1954_vm11 = vcmp.eq.s32.totalorder %v494_v8, 1 }
 0x29f   :  { %244 = vrot.lane.b32.xlu1 %v1643_v3, %s1538_s24 }
 0x2a2   :  { %v419_v21 = vpop.permute.xlu2 %418 }
 0x2a7   :  { %484 = vrot.lane.b32.xlu1 %v1784_v24, %s1539_s25  ;;  %v1127_v24 = vld [vmem:[#allocation2 + $0x198] sm:$0xff] }
 0x2aa   :  { %v295_v48 = vpop.permute.xlu2 %294 }
 0x2b1   :  { %v448_v3 = vpop.permute.xlu0 %447 }
 0x2b2   :  { %v449_v54 = vsel %vm146_vm6, %v446_v13, %v448_v3  ;;  %v453_v55 = vsel %vm146_vm6, %v448_v3, %v446_v13  ;;  %v1913_v57 = vpop.permute.xlu2 %569 }
 0x2b3   :  { %v454_v5 = vsel %vm1903_vm3, 0.0, %v449_v54  ;;  %v455_v33 = vsel %vm1907_vm5, 0.0, %v453_v55 }
 0x2b4   :  { %456 = vst [vmem:[#allocation2 + $0x210] sm:$0xf] %v454_v5  ;;  %v553_v36 = vrot.slane %v454_v5, 4  ;;  %v554_v37 = vrot.slane %v455_v33, 4 }
 0x2b5   :  { %457 = vst [vmem:[#allocation2 + $0x218] sm:$0xf] %v455_v33 }
 0x2b6   :  { %557 = vst [vmem:[#allocation2 + $0x130] sm:$0xf0] %v553_v36 }
 0x2b7   :  { %558 = vst [vmem:[#allocation2 + $0x138] sm:$0xf0] %v554_v37 }
 0x2b9   :  { %v385_v63 = vpop.permute.xlu0 %384  ;;  %v417_v59 = vpop.permute.xlu1 %416 }
 0x2ba   :  { %v420_v60 = vsel %vm146_vm6, %v417_v59, %v419_v21  ;;  %v424_v61 = vsel %vm146_vm6, %v419_v21, %v417_v59  ;;  %v1923_v35 = vpop.permute.xlu2 %276 }
 0x2bb   :  { %v425_v29 = vsel %vm1903_vm3, 0.0, %v420_v60  ;;  %v426_v34 = vsel %vm1907_vm5, 0.0, %v424_v61  ;;  %v1142_v16 = vld [vmem:[#allocation2 + $0x210] sm:$0xff] }
 0x2bc   :  { %v429_v18 = vrot.slane %v425_v29, 4  ;;  %v430_v20 = vrot.slane %v426_v34, 4  ;;  %540 = vst [vmem:[#allocation2 + $0xb0] sm:$0xf] %v425_v29  ;;  %1211 = vmatpush.msra.mxu2 %v1142_v16  ;;  %v1143_v22 = vld [vmem:[#allocation2 + $0x218] sm:$0xff] }
 0x2bd   :  { %541 = vst [vmem:[#allocation2 + $0xb8] sm:$0xf] %v426_v34  ;;  %1231 = vmatpush.msra.mxu3 %v1143_v22 }
 0x2be   :  { %433 = vst [vmem:[#allocation2 + $0x110] sm:$0xf0] %v429_v18  ;;  %1212 = vmatpush.msra.mxu2 %v1126_v23 }
 0x2bf   :  { %434 = vst [vmem:[#allocation2 + $0x118] sm:$0xf0] %v430_v20  ;;  %1232 = vmatpush.msra.mxu3 %v1127_v24 }
 0x2c1   :  { %v301_v12 = vpop.permute.xlu0 %300  ;;  %v388_v58 = vpop.permute.xlu1 %387 }
 0x2c2   :  { %v307_v27 = vsel %vm2345_vm10, %v295_v48, %v301_v12  ;;  %v390_v28 = vsel %vm2343_vm12, %v388_v58, %v385_v63  ;;  %v393_v31 = vsel %vm2343_vm12, %v385_v63, %v388_v58  ;;  %v1942_v7 = vpop.permute.xlu2 %658  ;;  %vm1958_vm12 = vcmp.eq.s32.totalorder %v495_v4, 1 }
 0x2c3   :  { %v308_v32 = vsel %vm1931_vm13, 0.0, %v307_v27  ;;  %v394_v41 = vsel %vm1931_vm13, 0.0, %v393_v31  ;;  %v395_v9 = vsel %vm1935_vm2, 0.0, %v390_v28 }
 0x2c4   :  { %310 = vst [vmem:[#allocation2 + $0x80] sm:$0xf] %v308_v32  ;;  %v378_v56 = vrot.slane %v308_v32, 4  ;;  %v402_v2 = vsel %vm1903_vm3, 0.0, %v394_v41  ;;  %v403_v39 = vsel %vm1907_vm5, 0.0, %v395_v9 }
 0x2c5   :  { %404 = vst [vmem:[#allocation2 + $0x90] sm:$0xf] %v402_v2  ;;  %v1110_v47 = vld [vmem:[#allocation2 + $0x110] sm:$0xff] }
 0x2c6   :  { %382 = vst [vmem:[#allocation2 + $0x10] sm:$0xf0] %v378_v56  ;;  %1213 = vmatpush.msra.mxu2 %v1110_v47  ;;  %v1111_v11 = vld [vmem:[#allocation2 + $0x118] sm:$0xff] }
 0x2c7   :  { %405 = vst [vmem:[#allocation2 + $0x98] sm:$0xf] %v403_v39  ;;  %1233 = vmatpush.msra.mxu3 %v1111_v11 }
 0x2c9   :  { %v303_v0 = vpop.permute.xlu1 %302  ;;  %v572_v48 = vpop.permute.xlu0 %571 }
 0x2ca   :  { %v304_v51 = vsel %vm2345_vm10, %v301_v12, %v303_v0  ;;  %v574_v52 = vsel %vm2344_vm9, %v1913_v57, %v572_v48  ;;  %v578_v3 = vsel %vm2344_vm9, %v572_v48, %v1913_v57  ;;  %v1967_v54 = vpop.permute.xlu2 %696  ;;  %vm261_vm9 = vcmp.lt.s32.totalorder %v1618_v44, 1 }
 0x2cb   :  { %v309_v55 = vsel %vm1935_vm2, 0.0, %v304_v51  ;;  %v579_v5 = vsel %vm1954_vm11, 0.0, %v574_v52  ;;  %v580_v33 = vsel %vm1958_vm12, 0.0, %v578_v3  ;;  %v262_v59 = vsel %vm261_vm9, 1, %v1530_v14 }
 0x2cc   :  { %311 = vst [vmem:[#allocation2 + $0x88] sm:$0xf] %v309_v55  ;;  %v379_v36 = vrot.slane %v309_v55, 4  ;;  %v581_v37 = vsel %vm1903_vm3, 0.0, %v579_v5  ;;  %v582_v62 = vsel %vm1907_vm5, 0.0, %v580_v33  ;;  %v1094_v57 = vld [vmem:[#allocation2 + $0x90] sm:$0xff] }
 0x2cd   :  { %583 = vst [vmem:[#allocation2 + $0x230] sm:$0xf] %v581_v37  ;;  %1214 = vmatpush.msra.mxu2 %v1094_v57  ;;  %v263_v14 = vperm.slane %v262_v59, 0  ;;  %v264_v20 = vperm.slane %v262_v59, 1  ;;  %v679_v51 = vmul.f32 0.75, %v1838_v38  ;;  %v680_v5 = vmul.f32 0.75, %v1855_v15 }
 0x2ce   :  { %383 = vst [vmem:[#allocation2 + $0x18] sm:$0xf0] %v379_v36  ;;  %v1095_v63 = vld [vmem:[#allocation2 + $0x98] sm:$0xff]  ;;  %v1108_v37 = vld [vmem:[#allocation2 + $0x100] sm:$0xff] }
 0x2cf   :  { %584 = vst [vmem:[#allocation2 + $0x238] sm:$0xf] %v582_v62  ;;  %1234 = vmatpush.msra.mxu3 %v1095_v63  ;;  %vm1991_vm9 = vcmp.eq.s32.totalorder %v263_v14, 1  ;;  %v1109_v63 = vld [vmem:[#allocation2 + $0x108] sm:$0xff] }
 0x2d0   :  { %v740_v59 = vld.sshfl [vmem:[#allocation1 + $0x8] sm:$0xff pattern:$0x75316420] }
 0x2d1   :  { %v273_v60 = vpop.permute.xlu1 %272  ;;  %v344_v61 = vpop.permute.xlu0 %343 }
 0x2d2   :  { %v278_v1 = vsel %vm2345_vm10, %v1923_v35, %v273_v60  ;;  %v281_v29 = vsel %vm2345_vm10, %v273_v60, %v1923_v35  ;;  %v1985_v34 = vpop.permute.xlu2 %714  ;;  %vm1995_vm10 = vcmp.eq.s32.totalorder %v264_v20, 1 }
 0x2d3   :  { %v282_v16 = vsel %vm1931_vm13, 0.0, %v281_v29  ;;  %v283_v44 = vsel %vm1935_vm2, 0.0, %v278_v1 }
 0x2d4   :  { %v286_v17 = vrot.slane %v282_v16, 4  ;;  %v287_v18 = vrot.slane %v283_v44, 4  ;;  %374 = vst [vmem:[#allocation2 + $0x10] sm:$0xf] %v282_v16  ;;  %v1146_v41 = vld [vmem:[#allocation2 + $0x230] sm:$0xff] }
 0x2d5   :  { %375 = vst [vmem:[#allocation2 + $0x18] sm:$0xf] %v283_v44 }
 0x2d6   :  { %290 = vst [vmem:[#allocation2] sm:$0xf0] %v286_v17  ;;  %v1147_v4 = vld [vmem:[#allocation2 + $0x238] sm:$0xff] }
 0x2d7   :  { %291 = vst [vmem:[#allocation2 + $0x8] sm:$0xf0] %v287_v18 }
 0x2d9   :  { %v350_v35 = vpop.permute.xlu1 %349  ;;  %v667_v23 = vpop.permute.xlu0 %666 }
 0x2da   :  { %v356_v25 = vsel %vm129_vm14, %v344_v61, %v350_v35  ;;  %v352_v12 = vpop.permute.xlu2 %351 }
 0x2db   :  { %v357_v58 = vsel %vm1991_vm9, 0.0, %v356_v25  ;;  %v353_v27 = vsel %vm129_vm14, %v350_v35, %v352_v12  ;;  %v1078_v28 = vld [vmem:[#allocation2 + $0x10] sm:$0xff] }
 0x2dc   :  { %359 = vst [vmem:[#allocation2 + $0x180] sm:$0xf] %v357_v58  ;;  %v466_v31 = vrot.slane %v357_v58, 4  ;;  %v358_v8 = vsel %vm1995_vm10, 0.0, %v353_v27  ;;  %1215 = vmatpush.msra.mxu2 %v1078_v28  ;;  %v1079_v32 = vld [vmem:[#allocation2 + $0x18] sm:$0xff] }
 0x2dd   :  { %360 = vst [vmem:[#allocation2 + $0x188] sm:$0xf] %v358_v8  ;;  %v467_v9 = vrot.slane %v358_v8, 4  ;;  %1235 = vmatpush.msra.mxu3 %v1079_v32 }
 0x2de   :  { %1291 = vmatpush.msrb.mxu2 %v1146_v41  ;;  %470 = vst [vmem:[#allocation2 + $0xa0] sm:$0xf0] %v466_v31  ;;  %v739_v31 = vld.sshfl [vmem:[#allocation1] sm:$0xff pattern:$0x75316420] }
 0x2df   :  { %1311 = vmatpush.msrb.mxu3 %v1147_v4  ;;  %471 = vst [vmem:[#allocation2 + $0xa8] sm:$0xf0] %v467_v9 }
 0x2e1   :  { %v655_v56 = vpop.permute.xlu1 %654  ;;  %v699_v2 = vpop.permute.xlu0 %698 }
 0x2e2   :  { %v660_v39 = vsel %vm129_vm14, %v1942_v7, %v655_v56  ;;  %v663_v47 = vsel %vm129_vm14, %v655_v56, %v1942_v7  ;;  %v700_v11 = vsel %vm129_vm14, %v1967_v54, %v699_v2  ;;  %v314_v32 = vpop.permute.xlu2 %313 }
 0x2e3   :  { %v664_v0 = vsel %vm1725_vm15, %v1838_v38, %v663_v47  ;;  %v665_v48 = vsel %vm1729_vm0, %v1855_v15, %v660_v39  ;;  %v710_v52 = vsel %vm1729_vm0, %v1845_v10, %v700_v11  ;;  %v1124_v3 = vld [vmem:[#allocation2 + $0x180] sm:$0xff] }
 0x2e4   :  { %v677_v55 = vmul.f32 0.25, %v664_v0  ;;  %v678_v7 = vmul.f32 0.25, %v665_v48  ;;  %v735_v33 = vmul.f32 0.25, %v710_v52  ;;  %1172 = vmatpush.msra.mxu0 %v1124_v3  ;;  %v1125_v36 = vld [vmem:[#allocation2 + $0x188] sm:$0xff] }
 0x2e5   :  { %1192 = vmatpush.msra.mxu1 %v1125_v36 }
 0x2e6   :  { %v681_v62 = vadd.f32 %v679_v51, %v677_v55  ;;  %v2022_v57 = vadd.f32 %v680_v5, %v678_v7  ;;  %1173 = vmatpush.msra.mxu0 %v1108_v37  ;;  %v2025_v60 = vadd.f32 %v740_v59, %v735_v33 }
 0x2e7   :  { %1193 = vmatpush.msra.mxu1 %v1109_v63 }
 0x2e8   :  { %838 = vst [vmem:[#allocation2 + $0x140] sm:$0xf] %v681_v62  ;;  %v906_v19 = vrot.slane %v681_v62, 4  ;;  %v907_v10 = vrot.slane %v2022_v57, 4  ;;  %1062 = vrot.lane.b32.xlu0 %v2022_v57, %s1537_s23  ;;  %916 = vrot.lane.b32.xlu2 %v2022_v57, %s1531_s17  ;;  %v867_v18 = vrot.slane %v2025_v60, 4 }
 0x2e9   :  { %839 = vst [vmem:[#allocation2 + $0x148] sm:$0xf] %v2022_v57  ;;  %914 = vrot.lane.b32.xlu1 %v681_v62, %s1531_s17  ;;  %v669_v61 = vpop.permute.xlu1 %668  ;;  %v717_v1 = vpop.permute.xlu0 %716 }
 0x2ea   :  { %910 = vst [vmem:[#allocation2 + $0xd0] sm:$0xf0] %v906_v19  ;;  %v670_v29 = vsel %vm146_vm6, %v667_v23, %v669_v61  ;;  %v674_v16 = vsel %vm146_vm6, %v669_v61, %v667_v23  ;;  %v507_v33 = vpop.permute.xlu2 %506 }
 0x2eb   :  { %911 = vst [vmem:[#allocation2 + $0xd8] sm:$0xf0] %v907_v10  ;;  %v675_v44 = vsel %vm1622_vm7, %v1838_v38, %v670_v29  ;;  %v676_v17 = vsel %vm1626_vm8, %v1855_v15, %v674_v16 }
 0x2ec   :  { %958 = vst [vmem:[#allocation2 + $0x60] sm:$0xf0] %v906_v19  ;;  %v683_v14 = vmul.f32 0.25, %v675_v44  ;;  %v684_v20 = vmul.f32 0.25, %v676_v17 }
 0x2ed   :  { %959 = vst [vmem:[#allocation2 + $0x68] sm:$0xf0] %v907_v10 }
 0x2ee   :  { %1027 = vst [vmem:[#allocation2 + $0x70] sm:$0xf] %v681_v62  ;;  %v2042_v35 = vadd.f32 %v683_v14, %v679_v51  ;;  %v2044_v25 = vadd.f32 %v684_v20, %v680_v5 }
 0x2ef   :  { %1028 = vst [vmem:[#allocation2 + $0x78] sm:$0xf] %v2022_v57 }
 0x2f0   :  { %871 = vst [vmem:[#allocation2 + $0x1c8] sm:$0xf0] %v867_v18  ;;  %v840_v38 = vrot.slane %v2042_v35, 4  ;;  %1014 = vrot.lane.b32.xlu0 %v2042_v35, %s1529_s14  ;;  %1060 = vrot.lane.b32.xlu2 %v681_v62, %s1537_s23  ;;  %v841_v15 = vrot.slane %v2044_v25, 4 }
 0x2f1   :  { %934 = vst [vmem:[#allocation2 + $0x1d8] sm:$0xf] %v2025_v60  ;;  %1016 = vrot.lane.b32.xlu1 %v2044_v25, %s1529_s14  ;;  %v691_v23 = vpop.permute.xlu1 %690  ;;  %v524_v12 = vpop.permute.xlu0 %523 }
 0x2f2   :  { %971 = vst [vmem:[#allocation2 + $0x168] sm:$0xf] %v2025_v60  ;;  %v703_v58 = vsel %vm129_vm14, %v691_v23, %v1967_v54  ;;  %v718_v54 = vsel %vm146_vm6, %v1985_v34, %v717_v1 }
 0x2f3   :  { %1034 = vst [vmem:[#allocation2 + $0xf8] sm:$0xf0] %v867_v18  ;;  %v709_v27 = vsel %vm1725_vm15, %v1843_v45, %v703_v58  ;;  %v732_v56 = vsel %vm1622_vm7, %v1870_v43, %v718_v54  ;;  %vm486_vm7 = vcmask 924672   ;;  %vm2378_vm15 = vcmask 908288  }
 0x2f4   :  { %844 = vst [vmem:[#allocation2 + $0x140] sm:$0xf0] %v840_v38  ;;  %v734_v28 = vmul.f32 0.25, %v709_v27  ;;  %v745_v51 = vmul.f32 0.25, %v732_v56  ;;  %v1114_v27 = vld [vmem:[#allocation2 + $0x130] sm:$0xff]  ;;  %vm2379_vm0 = vmmov %vm2378_vm15 }
 0x2f5   :  { %845 = vst [vmem:[#allocation2 + $0x148] sm:$0xf0] %v841_v15 }
 0x2f6   :  { %912 = vst [vmem:[#allocation2 + $0x150] sm:$0xf] %v2042_v35  ;;  %v2062_v8 = vadd.f32 %v739_v31, %v734_v28  ;;  %v1115_v28 = vld [vmem:[#allocation2 + $0x138] sm:$0xff]  ;;  %v1098_v31 = vld [vmem:[#allocation2 + $0xb0] sm:$0xff] }
 0x2f7   :  { %913 = vst [vmem:[#allocation2 + $0x158] sm:$0xf] %v2044_v25 }
 0x2f8   :  { %960 = vst [vmem:[#allocation2 + $0xe0] sm:$0xf] %v2042_v35  ;;  %v866_v41 = vrot.slane %v2062_v8, 4  ;;  %822 = vrot.lane.b32.xlu0 %v2042_v35, %s1535_s0  ;;  %818 = vrot.lane.b32.xlu2 %v2044_v25, %s1535_s0 }
 0x2f9   :  { %961 = vst [vmem:[#allocation2 + $0xe8] sm:$0xf] %v2044_v25  ;;  %995 = vrot.lane.b32.xlu1 %v681_v62, %s1529_s14  ;;  %v724_v40 = vpop.permute.xlu1 %723  ;;  %v318_v45 = vpop.permute.xlu0 %317 }
 0x2fa   :  { %1029 = vst [vmem:[#allocation2 + $0x70] sm:$0xf0] %v840_v38  ;;  %v726_v9 = vsel %vm146_vm6, %v717_v1, %v724_v40  ;;  %v319_v4 = vsel %vm129_vm14, %v318_v45, %v314_v32  ;;  %v322_v34 = vsel %vm129_vm14, %v314_v32, %v318_v45 }
 0x2fb   :  { %1030 = vst [vmem:[#allocation2 + $0x78] sm:$0xf0] %v841_v15  ;;  %v733_v2 = vsel %vm1626_vm8, %v1872_v46, %v726_v9  ;;  %v323_v39 = vsel %vm1991_vm9, 0.0, %v322_v34  ;;  %v324_v47 = vsel %vm1995_vm10, 0.0, %v319_v4  ;;  %v1083_v9 = vld [vmem:[#allocation2 + $0x38] sm:$0xff]  ;;  %vm1156_vm8 = vcmask 326656  }
 0x2fc   :  { %870 = vst [vmem:[#allocation2 + $0x1c0] sm:$0xf0] %v866_v41  ;;  %v746_v11 = vmul.f32 0.25, %v733_v2  ;;  %v327_v0 = vrot.slane %v323_v39, 4  ;;  %v328_v48 = vrot.slane %v324_v47, 4  ;;  %v1116_v21 = vld [vmem:[#allocation2 + $0x140] sm:$0xff] }
 0x2fd   :  { %933 = vst [vmem:[#allocation2 + $0x1d0] sm:$0xf] %v2062_v8 }
 0x2fe   :  { %970 = vst [vmem:[#allocation2 + $0x160] sm:$0xf] %v2062_v8  ;;  %v749_v49 = vrot.slane %v746_v11, 4 }
 0x2ff   :  { %1033 = vst [vmem:[#allocation2 + $0xf0] sm:$0xf0] %v866_v41  ;;  %v1082_v41 = vld [vmem:[#allocation2 + $0x30] sm:$0xff] }
 0x300   :  { %v750_v50 = vsel %vm117_vm4, %v745_v51, %v749_v49  ;;  %331 = vst [vmem:[#allocation2 + $0x80] sm:$0xf0] %v327_v0  ;;  %945 = vrot.lane.b32.xlu0 %v2025_v60, %s1531_s17  ;;  %997 = vrot.lane.b32.xlu2 %v2022_v57, %s1529_s14  ;;  %vm248_vm4 = vcmask 138240  }
 0x301   :  { %v2096_v43 = vadd.f32 %v750_v50, %v1868_v42  ;;  %332 = vst [vmem:[#allocation2 + $0x88] sm:$0xf0] %v328_v48  ;;  %892 = vrot.lane.b32.xlu1 %v2062_v8, %s1536_s22  ;;  %v526_v46 = vpop.permute.xlu1 %525  ;;  %v239_v29 = vpop.permute.xlu0 %238  ;;  %v2155_v50 = vld [vmem:[%s2341_s1] sm:$0xff] }
 0x302   :  { %458 = vst [vmem:[#allocation2 + $0x20] sm:$0xf] %v323_v39  ;;  %v527_v52 = vsel %vm79_vm1, %v524_v12, %v526_v46  ;;  %v531_v3 = vsel %vm79_vm1, %v526_v46, %v524_v12  ;;  %1504 = vmatmul.msk.f32.vlgmr.msra.gmra.mxu2 %vm1156_vm8, %v2155_v50  ;;  %1505 = vmatmul.msk.f32.vlgmr.msra.gmra.mxu3 %vm1156_vm8, %v2155_v50 }
 0x303   :  { %754 = vst [vmem:[#allocation1] ss:$2 sm:$0xff] %v2096_v43  ;;  %v532_v55 = vsel %vm1954_vm11, 0.0, %v527_v52  ;;  %v533_v7 = vsel %vm1958_vm12, 0.0, %v531_v3  ;;  %v1112_v3 = vld [vmem:[#allocation2 + $0x120] sm:$0xff] }
 0x304   :  { %459 = vst [vmem:[#allocation2 + $0x28] sm:$0xf] %v324_v47  ;;  %v563_v42 = vrot.slane %v532_v55, 4  ;;  %v564_v5 = vrot.slane %v533_v7, 4 }
 0x305   :  { %534 = vst [vmem:[#allocation2 + $0x220] sm:$0xf] %v532_v55  ;;  %v1113_v55 = vld [vmem:[#allocation2 + $0x128] sm:$0xff] }
 0x306   :  { %535 = vst [vmem:[#allocation2 + $0x228] sm:$0xf] %v533_v7  ;;  %v1096_v7 = vld [vmem:[#allocation2 + $0xa0] sm:$0xff] }
 0x307   :  { %567 = vst [vmem:[#allocation2 + $0x1b0] sm:$0xf0] %v563_v42  ;;  %v1092_v36 = vld [vmem:[#allocation2 + $0x80] sm:$0xff]  ;;  %v1097_v42 = vld [vmem:[#allocation2 + $0xa8] sm:$0xff] }
 0x308   :  { %568 = vst [vmem:[#allocation2 + $0x1b8] sm:$0xf0] %v564_v5  ;;  %1174 = vmatpush.msra.mxu0 %v1092_v36  ;;  %v1093_v37 = vld [vmem:[#allocation2 + $0x88] sm:$0xff]  ;;  %889 = vrot.lane.b32.xlu0 %v2025_v60, %s1536_s22 }
 0x309   :  { %1194 = vmatpush.msra.mxu1 %v1093_v37  ;;  %943 = vrot.lane.b32.xlu2 %v2062_v8, %s1531_s17  ;;  %v505_v62 = vpop.permute.xlu1 %504  ;;  %v483_v32 = vpop.permute.xlu0 %482 }
 0x30a   :  { %777 = vrot.lane.b32.xlu1 %v2025_v60, %s1532_s18  ;;  %v508_v57 = vsel %vm79_vm1, %v505_v62, %v507_v33  ;;  %v512_v63 = vsel %vm79_vm1, %v507_v33, %v505_v62  ;;  %v755_v59 = vld.sshfl [vmem:[#allocation1 + $0x8] sm:$0xff pattern:$0x75316420]  ;;  %v247_v60 = vpop.permute.xlu2 %246 }
 0x30b   :  { %v513_v19 = vsel %vm1954_vm11, 0.0, %v508_v57  ;;  %v514_v10 = vsel %vm1958_vm12, 0.0, %v512_v63  ;;  %759 = vst [vmem:[#allocation1] ss:$2 sm:$0xff] %v2096_v43  ;;  %v1080_v33 = vld [vmem:[#allocation2 + $0x20] sm:$0xff]  ;;  %v1081_v36 = vld [vmem:[#allocation2 + $0x28] sm:$0xff] }
 0x30c   :  { %v517_v61 = vrot.slane %v513_v19, 4  ;;  %v518_v1 = vrot.slane %v514_v10, 4  ;;  %559 = vst [vmem:[#allocation2 + $0x1b0] sm:$0xf] %v513_v19  ;;  %v1144_v0 = vld [vmem:[#allocation2 + $0x220] sm:$0xff] }
 0x30d   :  { %560 = vst [vmem:[#allocation2 + $0x1b8] sm:$0xf] %v514_v10  ;;  %v1145_v48 = vld [vmem:[#allocation2 + $0x228] sm:$0xff] }
 0x30e   :  { %521 = vst [vmem:[#allocation2 + $0x1a0] sm:$0xf0] %v517_v61 }
 0x30f   :  { %522 = vst [vmem:[#allocation2 + $0x1a8] sm:$0xf0] %v518_v1 }
 0x310   :  { %756 = vrot.lane.b32.xlu0 %v755_v59, %s1538_s24 }
 0x311   :  { %781 = vrot.lane.b32.xlu2 %v2062_v8, %s1532_s18  ;;  %v245_v16 = vpop.permute.xlu1 %244  ;;  %v1099_v8 = vld [vmem:[#allocation2 + $0xb8] sm:$0xff] }
 0x312   :  { %v249_v44 = vsel %vm248_vm4, %v245_v16, %v247_v60  ;;  %v252_v17 = vsel %vm248_vm4, %v239_v29, %v245_v16  ;;  %v760_v18 = vld.sshfl [vmem:[#allocation1] sm:$0xff pattern:$0x75316420]  ;;  %v2125_v14 = vld.sshfl [vmem:[#allocation1 + $0x8] sm:$0xff pattern:$0x75316420] }
 0x313   :  { %v259_v20 = vsel %vm1931_vm13, 0.0, %v252_v17  ;;  %v260_v38 = vsel %vm1935_vm2, 0.0, %v249_v44  ;;  %762 = vrot.lane.b32.xlu1 %v760_v18, %s1538_s24  ;;  %v1130_v15 = vld [vmem:[#allocation2 + $0x1b0] sm:$0xff]  ;;  %797 = vst [vmem:[#allocation1] ss:$2 sm:$0xff] %v2096_v43 }
 0x314   :  { %v267_v23 = vsel %vm1991_vm9, 0.0, %v259_v20  ;;  %v268_v12 = vsel %vm1995_vm10, 0.0, %v260_v38  ;;  %1292 = vmatpush.msrb.mxu2 %v1130_v15  ;;  %v1131_v58 = vld [vmem:[#allocation2 + $0x1b8] sm:$0xff] }
 0x315   :  { %269 = vst [vmem:[#allocation2] sm:$0xf] %v267_v23  ;;  %1312 = vmatpush.msrb.mxu3 %v1131_v58 }
 0x316   :  { %270 = vst [vmem:[#allocation2 + $0x8] sm:$0xf] %v268_v12  ;;  %1293 = vmatpush.msrb.mxu2 %v1114_v27 }
 0x317   :  { %1313 = vmatpush.msrb.mxu3 %v1115_v28 }
 0x318   :  { %1294 = vmatpush.msrb.mxu2 %v1098_v31 }
 0x319   :  { %1314 = vmatpush.msrb.mxu3 %v1099_v8  ;;  %v485_v54 = vpop.permute.xlu1 %484 }
 0x31a   :  { %v487_v40 = vsel %vm486_vm7, %v483_v32, %v485_v54  ;;  %v491_v45 = vsel %vm486_vm7, %v485_v54, %v483_v32  ;;  %1295 = vmatpush.msrb.mxu2 %v1082_v41  ;;  %v798_v4 = vld.sshfl [vmem:[#allocation1 + $0x8] sm:$0xff pattern:$0x75316420] }
 0x31b   :  { %v498_v34 = vsel %vm1954_vm11, 0.0, %v487_v40  ;;  %v499_v56 = vsel %vm1958_vm12, 0.0, %v491_v45  ;;  %1315 = vmatpush.msrb.mxu3 %v1083_v9  ;;  %799 = vrot.lane.b32.xlu2 %v798_v4, %s1532_s18  ;;  %802 = vst [vmem:[#allocation1] ss:$2 sm:$0xff] %v2096_v43 }
 0x31c   :  { %v500_v2 = vsel %vm1991_vm9, 0.0, %v498_v34  ;;  %v501_v39 = vsel %vm1995_vm10, 0.0, %v499_v56  ;;  %v1076_v47 = vld [vmem:[#allocation2] sm:$0xff]  ;;  %1508 = vmatmul.msk.f32.vlgmr.msrb.gmra.mxu2 %vm1156_vm8, %v2155_v50  ;;  %1509 = vmatmul.msk.f32.vlgmr.msrb.gmra.mxu3 %vm1156_vm8, %v2155_v50 }
 0x31d   :  { %502 = vst [vmem:[#allocation2 + $0x1a0] sm:$0xf] %v500_v2  ;;  %1175 = vmatpush.msra.mxu0 %v1076_v47  ;;  %v1077_v11 = vld [vmem:[#allocation2 + $0x8] sm:$0xff] }
 0x31e   :  { %503 = vst [vmem:[#allocation2 + $0x1a8] sm:$0xf] %v501_v39  ;;  %1195 = vmatpush.msra.mxu1 %v1077_v11  ;;  %1502 = vmatmul.msk.f32.vlgmr.msra.gmra.mxu0 %vm1156_vm8, %v2155_v50 }
 0x31f   :  { %1251 = vmatpush.msrb.mxu0 %v1144_v0  ;;  %1503 = vmatmul.msk.f32.vlgmr.msra.gmra.mxu1 %vm1156_vm8, %v2155_v50 }
 0x320   :  { %1271 = vmatpush.msrb.mxu1 %v1145_v48 }
 0x322   :  { %v803_v51 = vld.sshfl [vmem:[#allocation1] sm:$0xff pattern:$0x75316420]  ;;  %v804_v49 = vld.sshfl [vmem:[#allocation1 + $0x8] sm:$0xff pattern:$0x75316420] }
 0x323   :  { %805 = vrot.lane.b32.xlu0 %v803_v51, %s1532_s18  ;;  %807 = vrot.lane.b32.xlu1 %v804_v49, %s1532_s18  ;;  %846 = vst [vmem:[#allocation1] ss:$2 sm:$0xff] %v2096_v43 }
 0x324   :  { %v1128_v46 = vld [vmem:[#allocation2 + $0x1a0] sm:$0xff] }
 0x325   :  { %1252 = vmatpush.msrb.mxu0 %v1128_v46  ;;  %v1129_v52 = vld [vmem:[#allocation2 + $0x1a8] sm:$0xff] }
 0x326   :  { %1272 = vmatpush.msrb.mxu1 %v1129_v52 }
 0x327   :  { %1253 = vmatpush.msrb.mxu0 %v1112_v3 }
 0x328   :  { %1273 = vmatpush.msrb.mxu1 %v1113_v55 }
 0x329   :  { %1254 = vmatpush.msrb.mxu0 %v1096_v7 }
 0x32a   :  { %1274 = vmatpush.msrb.mxu1 %v1097_v42  ;;  %v847_v5 = vld.sshfl [vmem:[#allocation1 + $0x8] sm:$0xff pattern:$0x75316420] }
 0x32b   :  { %848 = vrot.lane.b32.xlu0 %v847_v5, %s1535_s0  ;;  %851 = vst [vmem:[#allocation1] ss:$2 sm:$0xff] %v2096_v43  ;;  %1255 = vmatpush.msrb.mxu0 %v1080_v33 }
 0x32c   :  { %1275 = vmatpush.msrb.mxu1 %v1081_v36  ;;  %1506 = vmatmul.msk.f32.vlgmr.msrb.gmra.mxu0 %vm1156_vm8, %v2155_v50 }
 0x32d   :  { %1507 = vmatmul.msk.f32.vlgmr.msrb.gmra.mxu1 %vm1156_vm8, %v2155_v50 }
 0x332   :  { %v853_v37 = vld.sshfl [vmem:[#allocation1 + $0x8] sm:$0xff pattern:$0x75316420]  ;;  %v852_v62 = vld.sshfl [vmem:[#allocation1] sm:$0xff pattern:$0x75316420] }
 0x333   :  { %980 = vrot.lane.b32.xlu0 %v2042_v35, %s1539_s25  ;;  %856 = vrot.lane.b32.xlu2 %v853_v37, %s1535_s0  ;;  %872 = vst [vmem:[#allocation1] ss:$2 sm:$0xff] %v2096_v43 }
 0x334   :  { %854 = vrot.lane.b32.xlu1 %v852_v62, %s1535_s0 }
 0x33a   :  { %v873_v57 = vld.sshfl [vmem:[#allocation1] sm:$0xff pattern:$0x75316420]  ;;  %v874_v63 = vld.sshfl [vmem:[#allocation1 + $0x8] sm:$0xff pattern:$0x75316420] }
 0x33b   :  { %764 = vrot.lane.b32.xlu2 %v2125_v14, %s1538_s24  ;;  %877 = vst [vmem:[#allocation2 + $0x240] sm:$0xf] %v873_v57 }
 0x33c   :  { %982 = vrot.lane.b32.xlu1 %v2044_v25, %s1539_s25  ;;  %878 = vst [vmem:[#allocation2 + $0x248] sm:$0xf] %v874_v63 }
 0x33d   :  { %936 = vst [vmem:[#allocation1 + $0x1] ss:$2 sm:$0xff] %v2096_v43 }
 0x342   :  { %v1148_v59 = vld [vmem:[#allocation2 + $0x240] sm:$0xff]  ;;  %v917_v61 = vpop.permute.xlu2 %916 }
 0x343   :  { %1331 = vmatpush.msra.mxu0 %v1148_v59  ;;  %v1149_v35 = vld [vmem:[#allocation2 + $0x248] sm:$0xff] }
 0x344   :  { %1351 = vmatpush.msra.mxu1 %v1149_v35  ;;  %v937_v19 = vld.sshfl [vmem:[#allocation1] sm:$0xff pattern:$0x75316420]  ;;  %v938_v10 = vld.sshfl [vmem:[#allocation1 + $0x8] sm:$0xff pattern:$0x75316420] }
 0x345   :  { %941 = vst [vmem:[#allocation2 + $0x1d0] sm:$0xf0] %v937_v19 }
 0x346   :  { %942 = vst [vmem:[#allocation2 + $0x1d8] sm:$0xf0] %v938_v10 }
 0x347   :  { %973 = vst [vmem:[#allocation1 + $0x1] ss:$2 sm:$0xff] %v2096_v43 }
 0x34a   :  { %v1061_v25 = vpop.permute.xlu2 %1060 }
 0x34d   :  { %v1135_v6 = vld [vmem:[#allocation2 + $0x1d8] sm:$0xff] }
 0x34e   :  { %v974_v1 = vld.sshfl [vmem:[#allocation1] sm:$0xff pattern:$0x75316420]  ;;  %v975_v29 = vld.sshfl [vmem:[#allocation1 + $0x8] sm:$0xff pattern:$0x75316420] }
 0x34f   :  { %1035 = vst [vmem:[#allocation1] ss:$2 sm:$0xff] %v2096_v43 }
 0x350   :  { %978 = vst [vmem:[#allocation2 + $0x160] sm:$0xf0] %v974_v1 }
 0x351   :  { %979 = vst [vmem:[#allocation2 + $0x168] sm:$0xf0] %v975_v29 }
 0x352   :  { %v819_v28 = vpop.permute.xlu2 %818 }
 0x356   :  { %v1036_v60 = vld.sshfl [vmem:[#allocation1] sm:$0xff pattern:$0x75316420]  ;;  %v1037_v16 = vld.sshfl [vmem:[#allocation1 + $0x8] sm:$0xff pattern:$0x75316420] }
 0x357   :  { %1040 = vst [vmem:[#allocation2 + $0x170] sm:$0xf] %v1036_v60 }
 0x358   :  { %1041 = vst [vmem:[#allocation2 + $0x178] sm:$0xf] %v1037_v16 }
 0x35a   :  { %v1063_v44 = vpop.permute.xlu0 %1062  ;;  %v998_v56 = vpop.permute.xlu2 %997 }
 0x35b   :  { %v1064_v17 = vsel %vm2378_vm15, %v1061_v25, %v1063_v44  ;;  %v1068_v18 = vsel %vm2379_vm0, %v1063_v44, %v1061_v25  ;;  %v915_v14 = vpop.permute.xlu1 %914 }
 0x35c   :  { %v1069_v20 = vsel %vm1954_vm11, 0.0, %v1064_v17  ;;  %v1070_v38 = vsel %vm1958_vm12, 0.0, %v1068_v18  ;;  %v918_v43 = vsel %vm146_vm6, %v915_v14, %v917_v61  ;;  %v922_v15 = vsel %vm146_vm6, %v917_v61, %v915_v14 }
 0x35d   :  { %v1071_v23 = vsel %vm1903_vm3, 0.0, %v1069_v20  ;;  %v1072_v12 = vsel %vm1907_vm5, 0.0, %v1070_v38  ;;  %v923_v58 = vsel %vm1903_vm3, 0.0, %v918_v43  ;;  %v924_v27 = vsel %vm1907_vm5, 0.0, %v922_v15  ;;  %v1134_v15 = vld [vmem:[#allocation2 + $0x1d0] sm:$0xff] }
 0x35e   :  { %1073 = vst [vmem:[#allocation2 + $0x270] sm:$0xf] %v1071_v23  ;;  %v927_v31 = vrot.slane %v923_v58, 4  ;;  %v928_v8 = vrot.slane %v924_v27, 4 }
 0x35f   :  { %1074 = vst [vmem:[#allocation2 + $0x278] sm:$0xf] %v1072_v12 }
 0x360   :  { %931 = vst [vmem:[#allocation2 + $0x150] sm:$0xf0] %v927_v31 }
 0x361   :  { %932 = vst [vmem:[#allocation2 + $0x158] sm:$0xf0] %v928_v8 }
 0x362   :  { %1031 = vst [vmem:[#allocation2 + $0xf0] sm:$0xf] %v923_v58  ;;  %v1015_v32 = vpop.permute.xlu0 %1014 }
 0x363   :  { %1032 = vst [vmem:[#allocation2 + $0xf8] sm:$0xf] %v924_v27  ;;  %v1017_v54 = vpop.permute.xlu1 %1016  ;;  %v944_v5 = vpop.permute.xlu2 %943 }
 0x364   :  { %v1018_v41 = vsel %vm79_vm1, %v1015_v32, %v1017_v54  ;;  %v1022_v40 = vsel %vm79_vm1, %v1017_v54, %v1015_v32 }
 0x365   :  { %v1023_v45 = vsel %vm1954_vm11, 0.0, %v1018_v41  ;;  %v1024_v9 = vsel %vm1958_vm12, 0.0, %v1022_v40 }
 0x366   :  { %1025 = vst [vmem:[#allocation2 + $0x260] sm:$0xf] %v1023_v45  ;;  %v1054_v4 = vrot.slane %v1023_v45, 4  ;;  %v1055_v34 = vrot.slane %v1024_v9, 4  ;;  %v1155_v30 = vld [vmem:[#allocation2 + $0x278] sm:$0xff] }
 0x367   :  { %1026 = vst [vmem:[#allocation2 + $0x268] sm:$0xf] %v1024_v9  ;;  %v1118_v12 = vld [vmem:[#allocation2 + $0x150] sm:$0xff] }
 0x368   :  { %1058 = vst [vmem:[#allocation2 + $0x1f0] sm:$0xf0] %v1054_v4  ;;  %v1119_v58 = vld [vmem:[#allocation2 + $0x158] sm:$0xff] }
 0x369   :  { %1059 = vst [vmem:[#allocation2 + $0x1f8] sm:$0xf0] %v1055_v34 }
 0x36a   :  { %v823_v2 = vpop.permute.xlu0 %822 }
 0x36b   :  { %v824_v39 = vsel %vm129_vm14, %v823_v2, %v819_v28  ;;  %v827_v47 = vsel %vm129_vm14, %v819_v28, %v823_v2  ;;  %v996_v11 = vpop.permute.xlu1 %995  ;;  %v782_v1 = vpop.permute.xlu2 %781 }
 0x36c   :  { %v828_v0 = vsel %vm1991_vm9, 0.0, %v827_v47  ;;  %v829_v48 = vsel %vm1995_vm10, 0.0, %v824_v39  ;;  %v999_v51 = vsel %vm79_vm1, %v996_v11, %v998_v56  ;;  %v1003_v49 = vsel %vm79_vm1, %v998_v56, %v996_v11 }
 0x36d   :  { %v832_v46 = vrot.slane %v828_v0, 4  ;;  %v833_v52 = vrot.slane %v829_v48, 4  ;;  %956 = vst [vmem:[#allocation2 + $0x60] sm:$0xf] %v828_v0  ;;  %v1004_v3 = vsel %vm1954_vm11, 0.0, %v999_v51  ;;  %v1005_v55 = vsel %vm1958_vm12, 0.0, %v1003_v49 }
 0x36e   :  { %957 = vst [vmem:[#allocation2 + $0x68] sm:$0xf] %v829_v48  ;;  %v1008_v7 = vrot.slane %v1004_v3, 4  ;;  %v1009_v42 = vrot.slane %v1005_v55, 4  ;;  %vm2380_vm1 = vcmask 121856  }
 0x36f   :  { %836 = vst [vmem:[#allocation2 + $0xc0] sm:$0xf0] %v832_v46  ;;  %vm2381_vm15 = vmmov %vm2380_vm1  ;;  %v1154_v46 = vld [vmem:[#allocation2 + $0x270] sm:$0xff] }
 0x370   :  { %837 = vst [vmem:[#allocation2 + $0xc8] sm:$0xf0] %v833_v52 }
 0x371   :  { %1012 = vst [vmem:[#allocation2 + $0x1e0] sm:$0xf0] %v1008_v7 }
 0x372   :  { %1013 = vst [vmem:[#allocation2 + $0x1e8] sm:$0xf0] %v1009_v42  ;;  %v946_v33 = vpop.permute.xlu0 %945 }
 0x373   :  { %1050 = vst [vmem:[#allocation2 + $0x1f0] sm:$0xf] %v1004_v3  ;;  %v947_v36 = vsel %vm146_vm6, %v944_v5, %v946_v33  ;;  %v951_v37 = vsel %vm146_vm6, %v946_v33, %v944_v5  ;;  %v893_v62 = vpop.permute.xlu1 %892  ;;  %vm2382_vm6 = vcmask 130048  }
 0x374   :  { %1051 = vst [vmem:[#allocation2 + $0x1f8] sm:$0xf] %v1005_v55  ;;  %v952_v57 = vsel %vm1903_vm3, 0.0, %v947_v36  ;;  %v953_v63 = vsel %vm1907_vm5, 0.0, %v951_v37  ;;  %vm2383_vm0 = vmmov %vm2382_vm6 }
 0x375   :  { %954 = vst [vmem:[#allocation2 + $0x250] sm:$0xf] %v952_v57  ;;  %v1044_v59 = vrot.slane %v952_v57, 4  ;;  %v1045_v35 = vrot.slane %v953_v63, 4  ;;  %v800_v27 = vpop.permute.xlu2 %799 }
 0x376   :  { %955 = vst [vmem:[#allocation2 + $0x258] sm:$0xf] %v953_v63 }
 0x377   :  { %1048 = vst [vmem:[#allocation2 + $0x170] sm:$0xf0] %v1044_v59 }
 0x378   :  { %1049 = vst [vmem:[#allocation2 + $0x178] sm:$0xf0] %v1045_v35  ;;  %v1106_v35 = vld [vmem:[#allocation2 + $0xf0] sm:$0xff] }
 0x37a   :  { %v890_v19 = vpop.permute.xlu0 %889  ;;  %v1138_v42 = vld [vmem:[#allocation2 + $0x1f0] sm:$0xff] }
 0x37b   :  { %v894_v10 = vsel %vm2380_vm1, %v893_v62, %v890_v19  ;;  %v897_v61 = vsel %vm2381_vm15, %v890_v19, %v893_v62  ;;  %v1139_v5 = vld [vmem:[#allocation2 + $0x1f8] sm:$0xff] }
 0x37c   :  { %v898_v29 = vsel %vm1931_vm13, 0.0, %v897_v61  ;;  %v899_v25 = vsel %vm1935_vm2, 0.0, %v894_v10  ;;  %v778_v60 = vpop.permute.xlu1 %777  ;;  %v1150_v16 = vld [vmem:[#allocation2 + $0x250] sm:$0xff] }
 0x37d   :  { %v900_v44 = vsel %vm1903_vm3, 0.0, %v898_v29  ;;  %v901_v17 = vsel %vm1907_vm5, 0.0, %v899_v25  ;;  %v783_v18 = vsel %vm2382_vm6, %v782_v1, %v778_v60  ;;  %v786_v14 = vsel %vm2383_vm0, %v778_v60, %v782_v1  ;;  %1371 = vmatpush.msra.mxu2 %v1150_v16  ;;  %v1151_v20 = vld [vmem:[#allocation2 + $0x258] sm:$0xff]  ;;  %vm2384_vm3 = vmmov %vm2383_vm0  ;;  %v1090_v25 = vld [vmem:[#allocation2 + $0x70] sm:$0xff] }
 0x37e   :  { %902 = vst [vmem:[#allocation2 + $0xd0] sm:$0xf] %v900_v44  ;;  %v787_v38 = vsel %vm1931_vm13, 0.0, %v786_v14  ;;  %v788_v43 = vsel %vm1935_vm2, 0.0, %v783_v18  ;;  %1391 = vmatpush.msra.mxu3 %v1151_v20  ;;  %vm2385_vm5 = vmmov %vm2383_vm0  ;;  %v1122_v36 = vld [vmem:[#allocation2 + $0x170] sm:$0xff]  ;;  %v1107_v29 = vld [vmem:[#allocation2 + $0xf8] sm:$0xff] }
 0x37f   :  { %903 = vst [vmem:[#allocation2 + $0xd8] sm:$0xf] %v901_v17  ;;  %v791_v53 = vrot.slane %v787_v38, 4  ;;  %v792_v23 = vrot.slane %v788_v43, 4  ;;  %1372 = vmatpush.msra.mxu2 %v1134_v15  ;;  %v1123_v59 = vld [vmem:[#allocation2 + $0x178] sm:$0xff] }
 0x380   :  { %879 = vst [vmem:[#allocation2 + $0x50] sm:$0xf] %v787_v38  ;;  %1392 = vmatpush.msra.mxu3 %v1135_v6  ;;  %v1091_v60 = vld [vmem:[#allocation2 + $0x78] sm:$0xff] }
 0x381   :  { %795 = vst [vmem:[#allocation2 + $0x40] sm:$0xf0] %v791_v53  ;;  %1373 = vmatpush.msra.mxu2 %v1118_v12 }
 0x382   :  { %796 = vst [vmem:[#allocation2 + $0x48] sm:$0xf0] %v792_v23  ;;  %1393 = vmatpush.msra.mxu3 %v1119_v58  ;;  %v757_v28 = vpop.permute.xlu0 %756  ;;  %v1117_v58 = vld [vmem:[#allocation2 + $0x148] sm:$0xff] }
 0x383   :  { %880 = vst [vmem:[#allocation2 + $0x58] sm:$0xf] %v788_v43 }
 0x385   :  { %v763_v31 = vpop.permute.xlu1 %762  ;;  %v1102_v8 = vld [vmem:[#allocation2 + $0xd0] sm:$0xff]  ;;  %v1217_v19 = vpop.f32.mrf.mxu2 }
 0x386   :  { %v769_v32 = vsel %vm248_vm4, %v757_v28, %v763_v31  ;;  %1374 = vmatpush.msra.mxu2 %v1102_v8  ;;  %v1103_v54 = vld [vmem:[#allocation2 + $0xd8] sm:$0xff]  ;;  %v1237_v1 = vpop.f32.mrf.mxu3  ;;  %1482 = vst [vmem:[%s2342_s3 + $0x10] sm:$0xff] %v1217_v19  ;;  %v1153_v8 = vld [vmem:[#allocation2 + $0x268] sm:$0xff] }
 0x387   :  { %v770_v41 = vsel %vm1931_vm13, 0.0, %v769_v32  ;;  %1394 = vmatpush.msra.mxu3 %v1103_v54  ;;  %1483 = vst [vmem:[%s2342_s3 + $0x18] sm:$0xff] %v1237_v1 }
 0x388   :  { %v772_v40 = vsel %vm1991_vm9, 0.0, %v770_v41  ;;  %v1120_v41 = vld [vmem:[#allocation2 + $0x160] sm:$0xff] }
 0x389   :  { %774 = vst [vmem:[#allocation2 + $0x40] sm:$0xf] %v772_v40  ;;  %v1121_v40 = vld [vmem:[#allocation2 + $0x168] sm:$0xff] }
 0x38d   :  { %v857_v45 = vpop.permute.xlu2 %856 }
 0x390   :  { %v1084_v24 = vld [vmem:[#allocation2 + $0x40] sm:$0xff] }
 0x395   :  { %v806_v9 = vpop.permute.xlu0 %805  ;;  %v765_v4 = vpop.permute.xlu2 %764 }
 0x396   :  { %v812_v34 = vsel %vm2384_vm3, %v800_v27, %v806_v9  ;;  %v766_v56 = vsel %vm248_vm4, %v763_v31, %v765_v4  ;;  %v808_v2 = vpop.permute.xlu1 %807  ;;  %v1152_v31 = vld [vmem:[#allocation2 + $0x260] sm:$0xff] }
 0x397   :  { %v813_v39 = vsel %vm1931_vm13, 0.0, %v812_v34  ;;  %v771_v47 = vsel %vm1935_vm2, 0.0, %v766_v56  ;;  %v809_v11 = vsel %vm2385_vm5, %v806_v9, %v808_v2  ;;  %v1088_v4 = vld [vmem:[#allocation2 + $0x60] sm:$0xff]  ;;  %v1089_v34 = vld [vmem:[#allocation2 + $0x68] sm:$0xff] }
 0x398   :  { %815 = vst [vmem:[#allocation2 + $0xc0] sm:$0xf] %v813_v39  ;;  %v883_v0 = vrot.slane %v813_v39, 4  ;;  %v773_v48 = vsel %vm1995_vm10, 0.0, %v771_v47  ;;  %v814_v51 = vsel %vm1935_vm2, 0.0, %v809_v11 }
 0x399   :  { %775 = vst [vmem:[#allocation2 + $0x48] sm:$0xf] %v773_v48  ;;  %v884_v49 = vrot.slane %v814_v51, 4 }
 0x39a   :  { %887 = vst [vmem:[#allocation2 + $0x50] sm:$0xf0] %v883_v0 }
 0x39b   :  { %816 = vst [vmem:[#allocation2 + $0xc8] sm:$0xf] %v814_v51  ;;  %v1177_v52 = vpop.f32.mrf.mxu0 }
 0x39c   :  { %888 = vst [vmem:[#allocation2 + $0x58] sm:$0xf0] %v884_v49  ;;  %v1197_v3 = vpop.f32.mrf.mxu1 }
 0x39d   :  { %1480 = vst [vmem:[%s2342_s3] sm:$0xff] %v1177_v52  ;;  %v849_v7 = vpop.permute.xlu0 %848 }
 0x39e   :  { %1481 = vst [vmem:[%s2342_s3 + $0x8] sm:$0xff] %v1197_v3 }
 0x39f   :  { %v1297_v53 = vpop.f32.mrf.mxu2  ;;  %v1317_v13 = vpop.f32.mrf.mxu3  ;;  %v1100_v27 = vld [vmem:[#allocation2 + $0xc0] sm:$0xff] }
 0x3a0   :  { %1486 = vst [vmem:[%s2342_s3 + $0x30] sm:$0xff] %v1297_v53  ;;  %v1085_v28 = vld [vmem:[#allocation2 + $0x48] sm:$0xff] }
 0x3a1   :  { %v1086_v26 = vld [vmem:[#allocation2 + $0x50] sm:$0xff]  ;;  %1487 = vst [vmem:[%s2342_s3 + $0x38] sm:$0xff] %v1317_v13 }
 0x3a2   :  { %1375 = vmatpush.msra.mxu2 %v1086_v26  ;;  %v1101_v22 = vld [vmem:[#allocation2 + $0xc8] sm:$0xff] }
 0x3a3   :  { %v1087_v55 = vld [vmem:[#allocation2 + $0x58] sm:$0xff]  ;;  %1512 = vmatmul.msk.f32.vlgmr.msra.gmra.mxu2 %vm1156_vm8, %v2155_v50 }
 0x3a4   :  { %1451 = vmatpush.msrb.mxu2 %v1154_v46  ;;  %1395 = vmatpush.msra.mxu3 %v1087_v55 }
 0x3a5   :  { %1513 = vmatmul.msk.f32.vlgmr.msra.gmra.mxu3 %vm1156_vm8, %v2155_v50  ;;  %v981_v17 = vpop.permute.xlu0 %980 }
 0x3a6   :  { %1471 = vmatpush.msrb.mxu3 %v1155_v30  ;;  %1452 = vmatpush.msrb.mxu2 %v1138_v42  ;;  %v855_v33 = vpop.permute.xlu1 %854 }
 0x3a7   :  { %v858_v37 = vsel %vm129_vm14, %v855_v33, %v857_v45  ;;  %v861_v62 = vsel %vm129_vm14, %v849_v7, %v855_v33 }
 0x3a8   :  { %1472 = vmatpush.msrb.mxu3 %v1139_v5  ;;  %1453 = vmatpush.msrb.mxu2 %v1122_v36  ;;  %v862_v57 = vsel %vm1991_vm9, 0.0, %v861_v62  ;;  %v863_v63 = vsel %vm1995_vm10, 0.0, %v858_v37 }
 0x3a9   :  { %864 = vst [vmem:[#allocation2 + $0x1c0] sm:$0xf] %v862_v57  ;;  %v964_v10 = vrot.slane %v862_v57, 4  ;;  %v965_v61 = vrot.slane %v863_v63, 4  ;;  %v1257_v16 = vpop.f32.mrf.mxu0 }
 0x3aa   :  { %1473 = vmatpush.msrb.mxu3 %v1123_v59  ;;  %1454 = vmatpush.msrb.mxu2 %v1106_v35  ;;  %865 = vst [vmem:[#allocation2 + $0x1c8] sm:$0xf] %v863_v63  ;;  %v1277_v44 = vpop.f32.mrf.mxu1 }
 0x3ab   :  { %968 = vst [vmem:[#allocation2 + $0xe0] sm:$0xf0] %v964_v10 }
 0x3ac   :  { %1474 = vmatpush.msrb.mxu3 %v1107_v29  ;;  %1455 = vmatpush.msrb.mxu2 %v1090_v25  ;;  %969 = vst [vmem:[#allocation2 + $0xe8] sm:$0xf0] %v965_v61 }
 0x3ad   :  { %1516 = vmatmul.msk.f32.vlgmr.msrb.gmra.mxu2 %vm1156_vm8, %v2155_v50  ;;  %1484 = vst [vmem:[%s2342_s3 + $0x20] sm:$0xff] %v1257_v16 }
 0x3ae   :  { %1475 = vmatpush.msrb.mxu3 %v1091_v60  ;;  %v983_v18 = vpop.permute.xlu1 %982  ;;  %1485 = vst [vmem:[%s2342_s3 + $0x28] sm:$0xff] %v1277_v44 }
 0x3af   :  { %1517 = vmatmul.msk.f32.vlgmr.msrb.gmra.mxu3 %vm1156_vm8, %v2155_v50  ;;  %v984_v14 = vsel %vm486_vm7, %v981_v17, %v983_v18  ;;  %v988_v20 = vsel %vm486_vm7, %v983_v18, %v981_v17 }
 0x3b0   :  { %v989_v38 = vsel %vm1954_vm11, 0.0, %v984_v14  ;;  %v990_v43 = vsel %vm1958_vm12, 0.0, %v988_v20  ;;  %v1132_v15 = vld [vmem:[#allocation2 + $0x1c0] sm:$0xff] }
 0x3b1   :  { %v991_v23 = vsel %vm1991_vm9, 0.0, %v989_v38  ;;  %v992_v6 = vsel %vm1995_vm10, 0.0, %v990_v43  ;;  %1332 = vmatpush.msra.mxu0 %v1132_v15  ;;  %v1133_v12 = vld [vmem:[#allocation2 + $0x1c8] sm:$0xff] }
 0x3b2   :  { %993 = vst [vmem:[#allocation2 + $0x1e0] sm:$0xf] %v991_v23  ;;  %1352 = vmatpush.msra.mxu1 %v1133_v12  ;;  %v1104_v45 = vld [vmem:[#allocation2 + $0xe0] sm:$0xff] }
 0x3b3   :  { %994 = vst [vmem:[#allocation2 + $0x1e8] sm:$0xf] %v992_v6  ;;  %1333 = vmatpush.msra.mxu0 %v1116_v21  ;;  %v1105_v9 = vld [vmem:[#allocation2 + $0xe8] sm:$0xff] }
 0x3b4   :  { %1353 = vmatpush.msra.mxu1 %v1117_v58 }
 0x3b5   :  { %1334 = vmatpush.msra.mxu0 %v1100_v27 }
 0x3b6   :  { %1354 = vmatpush.msra.mxu1 %v1101_v22 }
 0x3b7   :  { %1335 = vmatpush.msra.mxu0 %v1084_v24 }
 0x3b8   :  { %1355 = vmatpush.msra.mxu1 %v1085_v28  ;;  %1510 = vmatmul.msk.f32.vlgmr.msra.gmra.mxu0 %vm1156_vm8, %v2155_v50 }
 0x3b9   :  { %1411 = vmatpush.msrb.mxu0 %v1152_v31  ;;  %v1136_v32 = vld [vmem:[#allocation2 + $0x1e0] sm:$0xff]  ;;  %1511 = vmatmul.msk.f32.vlgmr.msra.gmra.mxu1 %vm1156_vm8, %v2155_v50 }
 0x3ba   :  { %1431 = vmatpush.msrb.mxu1 %v1153_v8  ;;  %v1137_v54 = vld [vmem:[#allocation2 + $0x1e8] sm:$0xff] }
 0x3bb   :  { %1412 = vmatpush.msrb.mxu0 %v1136_v32 }
 0x3bc   :  { %1432 = vmatpush.msrb.mxu1 %v1137_v54 }
 0x3bd   :  { %1413 = vmatpush.msrb.mxu0 %v1120_v41 }
 0x3be   :  { %1433 = vmatpush.msrb.mxu1 %v1121_v40 }
 0x3bf   :  { %1414 = vmatpush.msrb.mxu0 %v1104_v45 }
 0x3c0   :  { %1434 = vmatpush.msrb.mxu1 %v1105_v9 }
 0x3c1   :  { %1415 = vmatpush.msrb.mxu0 %v1088_v4 }
 0x3c2   :  { %1435 = vmatpush.msrb.mxu1 %v1089_v34  ;;  %1514 = vmatmul.msk.f32.vlgmr.msrb.gmra.mxu0 %vm1156_vm8, %v2155_v50 }
 0x3c3   :  { %1515 = vmatmul.msk.f32.vlgmr.msrb.gmra.mxu1 %vm1156_vm8, %v2155_v50 }
 0x426   :  { %v1377_v56 = vpop.f32.mrf.mxu2 }
 0x427   :  { %1490 = vst [vmem:[%s2342_s3 + $0x50] sm:$0xff] %v1377_v56 }
 0x428   :  { %v1397_v2 = vpop.f32.mrf.mxu3 }
 0x429   :  { %1491 = vst [vmem:[%s2342_s3 + $0x58] sm:$0xff] %v1397_v2 }
 0x430   :  { %v1457_v39 = vpop.f32.mrf.mxu2 }
 0x431   :  { %1494 = vst [vmem:[%s2342_s3 + $0x70] sm:$0xff] %v1457_v39 }
 0x432   :  { %v1477_v47 = vpop.f32.mrf.mxu3 }
 0x433   :  { %1495 = vst [vmem:[%s2342_s3 + $0x78] sm:$0xff] %v1477_v47 }
 0x435   :  { %v1337_v50 = vpop.f32.mrf.mxu0 }
 0x436   :  { %1488 = vst [vmem:[%s2342_s3 + $0x40] sm:$0xff] %v1337_v50  ;;  %v1357_v11 = vpop.f32.mrf.mxu1 }
 0x437   :  { %1489 = vst [vmem:[%s2342_s3 + $0x48] sm:$0xff] %v1357_v11 }
 0x43f   :  { %v1417_v0 = vpop.f32.mrf.mxu0 }
 0x440   :  { %1492 = vst [vmem:[%s2342_s3 + $0x60] sm:$0xff] %v1417_v0  ;;  %v1437_v48 = vpop.f32.mrf.mxu1 }
 0x441   :  { %1493 = vst [vmem:[%s2342_s3 + $0x68] sm:$0xff] %v1437_v48 }

</bundles_post_ra>
